<compile_context>
chip_gen: v7x
topology: tpu7x:2x2x1
jax: 0.10.0
libtpu: 0.0.40
codegen_flags: <defaults>
</compile_context>

<pallas_src>
import math

import jax
import jax.numpy as jnp
from jax import lax
from jax.experimental import pallas as pl
from jax.experimental.pallas import tpu as pltpu  # noqa: F401  (kept for TPU-specific extensions)

# ----------------------------- config ---------------------------------
B = 2            # batch
S = 8            # max_seq_length
BS = B * S       # flattened rows
H = 128          # hidden size
NH = 4           # attention heads
HD = H // NH     # head dim
F = 256          # FFN intermediate
L = 2            # encoder layers
V = 64           # vocab size
NUM_TASKS = 3    # len(lora_adaptations)
LORA_R = 8
LORA_ALPHA = 16.0
LORA_SCALE = LORA_ALPHA / LORA_R
LN_EPS = 1e-12

LORA_ADAPTATIONS = ["retrieval.query", "retrieval.passage", "classification"]
ADAPTATION_MAP = {n: i for i, n in enumerate(LORA_ADAPTATIONS)}

_QK_DN = (((1,), (1,)), ((), ()))   # contract last dims (q . k^T without .T)


# --------------------------- pallas kernel -----------------------------
def _layernorm(x, g, b):
    mu = jnp.mean(x, axis=-1, keepdims=True)
    var = jnp.mean((x - mu) ** 2, axis=-1, keepdims=True)
    return (x - mu) * lax.rsqrt(var + LN_EPS) * g + b


def encoder_kernel(x_ref, bias_ref,
                   wqkv_ref, bqkv_ref, wo_ref, bo_ref,
                   ln1g_ref, ln1b_ref,
                   w1_ref, b1_ref, w2_ref, b2_ref,
                   ln2g_ref, ln2b_ref,
                   out_ref):
    x = x_ref[...]                                    # [BS, H] f32
    bias = bias_ref[...]                              # [NH*BS, NH*BS] f32 (head+example block-diag + key pad)

    def pack_heads(qkv, off):
        # [BS, 3H] lane-slices -> head-major sublane-packed [NH*BS, HD]
        return jnp.concatenate(
            [qkv[:, off + h * HD: off + (h + 1) * HD] for h in range(NH)],
            axis=0).astype(jnp.bfloat16)

    for l in range(L):
        # ---- fused QKV (LoRA + 1/sqrt(HD) already folded into weights) ---
        xb = x.astype(jnp.bfloat16)
        qkv = jnp.dot(xb, wqkv_ref[l],
                      preferred_element_type=jnp.float32) + bqkv_ref[l]     # [BS, 3H] f32

        qp = pack_heads(qkv, 0)                        # [NH*BS, HD] bf16
        kp = pack_heads(qkv, H)
        vp = pack_heads(qkv, 2 * H)

        # ---- all heads in one scores / softmax / PV pass -----------------
        s = lax.dot_general(qp, kp, _QK_DN,
                            preferred_element_type=jnp.float32)             # [NH*BS, NH*BS]
        s = s + bias
        s = s - jnp.max(s, axis=-1, keepdims=True)
        p = jnp.exp(s)
        p = p * pl.reciprocal(jnp.sum(p, axis=-1, keepdims=True), approx=True)
        ctxp = jnp.dot(p.astype(jnp.bfloat16), vp,
                       preferred_element_type=jnp.float32)                  # [NH*BS, HD]

        # ---- unpack heads back to lanes, single full-depth W_o matmul ----
        ctx = jnp.concatenate(
            [ctxp[h * BS:(h + 1) * BS, :] for h in range(NH)], axis=1)      # [BS, H]
        attn = jnp.dot(ctx.astype(jnp.bfloat16), wo_ref[l],
                       preferred_element_type=jnp.float32) + bo_ref[l]
        x = _layernorm(x + attn, ln1g_ref[l], ln1b_ref[l])

        # ---- feed-forward -------------------------------------------------
        h1 = jnp.dot(x.astype(jnp.bfloat16), w1_ref[l],
                     preferred_element_type=jnp.float32) + b1_ref[l]
        # TODO(synk): HF XLM-RoBERTa uses exact erf GELU; tanh approximation kept here.
        h1 = jax.nn.gelu(h1, approximate=True)
        ffn = jnp.dot(h1.astype(jnp.bfloat16), w2_ref[l],
                      preferred_element_type=jnp.float32) + b2_ref[l]
        x = _layernorm(x + ffn, ln2g_ref[l], ln2b_ref[l])

    out_ref[...] = x


# ---------------------------- host helpers ------------------------------
def fold_weights(params, task_id, lora_enabled):
    """Fold LoRA (per task) and the softmax scale into the fused QKV weight."""
    w = params["wqkv"]                                             # [L, H, 3H] f32
    if lora_enabled:
        la = params["la"][:, task_id]                              # [L, H, R]
        lb = params["lb"][:, task_id]                              # [L, R, 3H]
        w = w + LORA_SCALE * jnp.einsum("lhr,lrk->lhk", la, lb)
    # fold 1/sqrt(HD) into the Q columns of the weight and bias
    scale = 1.0 / math.sqrt(HD)
    col = jnp.concatenate([jnp.full((H,), scale, jnp.float32),
                           jnp.ones((2 * H,), jnp.float32)])
    w = w * col
    b = params["bqkv"] * col
    return {
        "wqkv": w.astype(jnp.bfloat16),
        "bqkv": b.astype(jnp.float32),
        "wo":   params["wo"].astype(jnp.bfloat16),
        "bo":   params["bo"],
        "ln1g": params["ln1g"], "ln1b": params["ln1b"],
        "w1":   params["w1"].astype(jnp.bfloat16), "b1": params["b1"],
        "w2":   params["w2"].astype(jnp.bfloat16), "b2": params["b2"],
        "ln2g": params["ln2g"], "ln2b": params["ln2b"],
    }


def build_attn_bias(attention_mask):
    """[NH*BS, NH*BS] additive bias for head-packed attention.

    Row/col index = head * BS + (example * S + token).  A query attends to a
    key iff same head, same example, and the key token is not padding.
    """
    R = NH * BS
    idx = jnp.arange(R, dtype=jnp.int32)
    head = idx // BS
    ex = (idx % BS) // S
    same_head = head[:, None] == head[None, :]
    same_ex = ex[:, None] == ex[None, :]
    kvalid = jnp.tile(attention_mask.reshape(BS) > 0, NH)[None, :]
    return jnp.where(same_head & same_ex & kvalid, 0.0, -1e9).astype(jnp.float32)


def encoder_pallas(cp, x_emb, attention_mask):
    x_flat = x_emb.reshape(BS, H).astype(jnp.float32)
    bias = build_attn_bias(attention_mask)
    # Single step, no grid: every operand is a whole-array VMEM block
    # (~0.5 MiB of bf16 weights at these toy shapes).
    out = pl.pallas_call(
        encoder_kernel,
        out_shape=jax.ShapeDtypeStruct((BS, H), jnp.float32),
    )(x_flat, bias,
      cp["wqkv"], cp["bqkv"], cp["wo"], cp["bo"],
      cp["ln1g"], cp["ln1b"],
      cp["w1"], cp["b1"], cp["w2"], cp["b2"],
      cp["ln2g"], cp["ln2b"])
    return out.reshape(B, S, H)


# ---------------------- glue: embeddings + forward ----------------------
def embed(params, input_ids):
    tok = params["tok_emb"][input_ids]                 # [B,S,H]
    pos = params["pos_emb"][:S][None]                  # [1,S,H]
    typ = params["type_emb"][0][None, None]            # [1,1,H]
    e = tok + pos + typ
    mu = jnp.mean(e, axis=-1, keepdims=True)
    var = jnp.mean((e - mu) ** 2, axis=-1, keepdims=True)
    return (e - mu) * lax.rsqrt(var + LN_EPS) * params["emb_ln_g"] + params["emb_ln_b"]


def transformer_forward(params, features, task=None, default_task=None):
    """Mirrors Transformer.forward: returns features updated with token_embeddings."""
    task = task or default_task
    if task is not None and task not in ADAPTATION_MAP:
        raise ValueError(f"Unsupported task '{task}'. Supported tasks are: "
                         f"{', '.join(LORA_ADAPTATIONS)}.")
    input_ids = features["input_ids"]
    attention_mask = features["attention_mask"]
    lora_enabled = task is not None
    task_id = ADAPTATION_MAP[task] if lora_enabled else 0
    # NOTE: like the original Transformer.forward, the adapter mask is uniform
    # across the batch, so the LoRA delta is folded into the weights once here.

    x_emb = embed(params, input_ids)
    cp = fold_weights(params, task_id, lora_enabled)
    token_embeddings = encoder_pallas(cp, x_emb, attention_mask)
    out = dict(features)
    out.update({"token_embeddings": token_embeddings,
                "attention_mask": attention_mask})
    return out


# ---------------------------- reference --------------------------------
def ref_encoder(cp, x, attention_mask):
    """Pure-JAX reference using the same folded weights / bf16-matmul recipe."""
    p = cp
    neg = (1.0 - attention_mask.astype(jnp.float32)) * (-1e9)    # [B,S]
    f32, bf16 = jnp.float32, jnp.bfloat16
    for l in range(L):
        xb = x.astype(bf16)
        qkv = jnp.einsum("bsh,hk->bsk", xb, p["wqkv"][l],
                         preferred_element_type=f32) + p["bqkv"][l]
        q, k, v = jnp.split(qkv, 3, axis=-1)
        q = q.reshape(B, S, NH, HD).astype(bf16)
        k = k.reshape(B, S, NH, HD).astype(bf16)
        v = v.reshape(B, S, NH, HD).astype(bf16)
        s = jnp.einsum("bqnd,bknd->bnqk", q, k, preferred_element_type=f32)
        s = s + neg[:, None, None, :]
        pr = jax.nn.softmax(s, axis=-1)
        ctx = jnp.einsum("bnqk,bknd->bqnd", pr.astype(bf16), v,
                         preferred_element_type=f32).reshape(B, S, H)
        attn = jnp.einsum("bsh,hk->bsk", ctx.astype(bf16), p["wo"][l],
                          preferred_element_type=f32) + p["bo"][l]
        y = x + attn
        mu = jnp.mean(y, -1, keepdims=True)
        var = jnp.mean((y - mu) ** 2, -1, keepdims=True)
        x = (y - mu) * lax.rsqrt(var + LN_EPS) * p["ln1g"][l] + p["ln1b"][l]
        h1 = jax.nn.gelu(jnp.einsum("bsh,hf->bsf", x.astype(bf16), p["w1"][l],
                                    preferred_element_type=f32) + p["b1"][l],
                         approximate=True)
        ffn = jnp.einsum("bsf,fh->bsh", h1.astype(bf16), p["w2"][l],
                         preferred_element_type=f32) + p["b2"][l]
        y = x + ffn
        mu = jnp.mean(y, -1, keepdims=True)
        var = jnp.mean((y - mu) ** 2, -1, keepdims=True)
        x = (y - mu) * lax.rsqrt(var + LN_EPS) * p["ln2g"][l] + p["ln2b"][l]
    return x


# -------------------------- param init ---------------------------------
def init_params(key):
    ks = jax.random.split(key, 16)
    n = lambda k, *shape: (jax.random.normal(k, shape, jnp.float32) * 0.02)
    return {
        "tok_emb":  n(ks[0], V, H),
        "pos_emb":  n(ks[1], S, H),
        "type_emb": n(ks[2], 1, H),
        "emb_ln_g": jnp.ones((H,), jnp.float32),
        "emb_ln_b": jnp.zeros((H,), jnp.float32),
        "wqkv": n(ks[3], L, H, 3 * H),
        "bqkv": jnp.zeros((L, 1, 3 * H), jnp.float32),
        "la":   n(ks[4], L, NUM_TASKS, H, LORA_R),
        "lb":   n(ks[5], L, NUM_TASKS, LORA_R, 3 * H),
        "wo":   n(ks[6], L, H, H),
        "bo":   jnp.zeros((L, 1, H), jnp.float32),
        "ln1g": jnp.ones((L, 1, H), jnp.float32),
        "ln1b": jnp.zeros((L, 1, H), jnp.float32),
        "w1":   n(ks[7], L, H, F),
        "b1":   jnp.zeros((L, 1, F), jnp.float32),
        "w2":   n(ks[8], L, F, H),
        "b2":   jnp.zeros((L, 1, H), jnp.float32),
        "ln2g": jnp.ones((L, 1, H), jnp.float32),
        "ln2b": jnp.zeros((L, 1, H), jnp.float32),
    }


# ------------------------------ main ------------------------------------
if __name__ == "__main__":
    key = jax.random.PRNGKey(0)
    pkey, ikey = jax.random.split(key)
    params = init_params(pkey)

    input_ids = jax.random.randint(ikey, (B, S), 0, V, dtype=jnp.int32)
    attention_mask = jnp.array([[1, 1, 1, 1, 1, 1, 1, 1],
                                [1, 1, 1, 1, 1, 0, 0, 0]], dtype=jnp.int32)
    features = {"input_ids": input_ids, "attention_mask": attention_mask}

    out = transformer_forward(params, features, task="retrieval.query")
    token_embeddings = jax.block_until_ready(out["token_embeddings"])

    # correctness check against a pure-JAX reference (same folded bf16/f32 recipe)
    x_emb = embed(params, input_ids)
    cp = fold_weights(params, ADAPTATION_MAP["retrieval.query"], True)
    ref = ref_encoder(cp, x_emb, attention_mask)

    assert token_embeddings.shape == (B, S, H)
    assert jnp.all(jnp.isfinite(token_embeddings))
    assert jnp.allclose(token_embeddings, ref, atol=5e-3, rtol=5e-3)

    print("KERNEL_OK")
</pallas_src>

<mosaic_0001>
module attributes {stable_mosaic.version = 11 : i64} {
  func.func @encoder_kernel(%arg0: memref<16x128xf32, #tpu.memory_space<vmem>>, %arg1: memref<64x64xf32, #tpu.memory_space<vmem>>, %arg2: memref<2x128x384xbf16, #tpu.memory_space<vmem>>, %arg3: memref<2x1x384xf32, #tpu.memory_space<vmem>>, %arg4: memref<2x128x128xbf16, #tpu.memory_space<vmem>>, %arg5: memref<2x1x128xf32, #tpu.memory_space<vmem>>, %arg6: memref<2x1x128xf32, #tpu.memory_space<vmem>>, %arg7: memref<2x1x128xf32, #tpu.memory_space<vmem>>, %arg8: memref<2x128x256xbf16, #tpu.memory_space<vmem>>, %arg9: memref<2x1x256xf32, #tpu.memory_space<vmem>>, %arg10: memref<2x256x128xbf16, #tpu.memory_space<vmem>>, %arg11: memref<2x1x128xf32, #tpu.memory_space<vmem>>, %arg12: memref<2x1x128xf32, #tpu.memory_space<vmem>>, %arg13: memref<2x1x128xf32, #tpu.memory_space<vmem>>, %arg14: memref<16x128xf32, #tpu.memory_space<vmem>>) attributes {dimension_semantics = [], scalar_prefetch = 0 : i64, scratch_operands = 0 : i64, tpu.core_type = #tpu.core_type<tc>} {
    %c0 = arith.constant 0 : index
    %c0_0 = arith.constant 0 : index
    %0 = vector.load %arg0[%c0, %c0_0] : memref<16x128xf32, #tpu.memory_space<vmem>>, vector<16x128xf32>
    %c0_1 = arith.constant 0 : index
    %c0_2 = arith.constant 0 : index
    %1 = vector.load %arg1[%c0_1, %c0_2] : memref<64x64xf32, #tpu.memory_space<vmem>>, vector<64x64xf32>
    %2 = arith.truncf %0 : vector<16x128xf32> to vector<16x128xbf16>
    %c0_3 = arith.constant 0 : index
    %c0_4 = arith.constant 0 : index
    %c0_5 = arith.constant 0 : index
    %3 = vector.load %arg2[%c0_3, %c0_4, %c0_5] : memref<2x128x384xbf16, #tpu.memory_space<vmem>>, vector<1x128x384xbf16>
    %4 = vector.shape_cast %3 : vector<1x128x384xbf16> to vector<128x384xbf16>
    %cst = arith.constant dense<0.000000e+00> : vector<16x384xf32>
    %5 = tpu.matmul %2, %4, %cst {dimension_numbers = #tpu.dot_dimension_numbers<[1], [0], [0], [1], [0, 0, 1, 1], [], []>} : vector<16x128xbf16>, vector<128x384xbf16>, vector<16x384xf32> -> vector<16x384xf32>
    %c0_6 = arith.constant 0 : index
    %c0_7 = arith.constant 0 : index
    %c0_8 = arith.constant 0 : index
    %6 = vector.load %arg3[%c0_6, %c0_7, %c0_8] : memref<2x1x384xf32, #tpu.memory_space<vmem>>, vector<1x1x384xf32>
    %7 = vector.shape_cast %6 : vector<1x1x384xf32> to vector<1x384xf32>
    %8 = vector.broadcast %7 : vector<1x384xf32> to vector<16x384xf32>
    %9 = arith.addf %5, %8 : vector<16x384xf32>
    %10 = vector.extract_strided_slice %9 {offsets = [0, 0], sizes = [16, 32], strides = [1, 1]} : vector<16x384xf32> to vector<16x32xf32>
    %11 = vector.extract_strided_slice %9 {offsets = [0, 32], sizes = [16, 32], strides = [1, 1]} : vector<16x384xf32> to vector<16x32xf32>
    %12 = vector.extract_strided_slice %9 {offsets = [0, 64], sizes = [16, 32], strides = [1, 1]} : vector<16x384xf32> to vector<16x32xf32>
    %13 = vector.extract_strided_slice %9 {offsets = [0, 96], sizes = [16, 32], strides = [1, 1]} : vector<16x384xf32> to vector<16x32xf32>
    %14 = tpu.concatenate %10, %11, %12, %13 in 0 : vector<16x32xf32>, vector<16x32xf32>, vector<16x32xf32>, vector<16x32xf32> -> vector<64x32xf32>
    %15 = arith.truncf %14 : vector<64x32xf32> to vector<64x32xbf16>
    %16 = vector.extract_strided_slice %9 {offsets = [0, 128], sizes = [16, 32], strides = [1, 1]} : vector<16x384xf32> to vector<16x32xf32>
    %17 = vector.extract_strided_slice %9 {offsets = [0, 160], sizes = [16, 32], strides = [1, 1]} : vector<16x384xf32> to vector<16x32xf32>
    %18 = vector.extract_strided_slice %9 {offsets = [0, 192], sizes = [16, 32], strides = [1, 1]} : vector<16x384xf32> to vector<16x32xf32>
    %19 = vector.extract_strided_slice %9 {offsets = [0, 224], sizes = [16, 32], strides = [1, 1]} : vector<16x384xf32> to vector<16x32xf32>
    %20 = tpu.concatenate %16, %17, %18, %19 in 0 : vector<16x32xf32>, vector<16x32xf32>, vector<16x32xf32>, vector<16x32xf32> -> vector<64x32xf32>
    %21 = arith.truncf %20 : vector<64x32xf32> to vector<64x32xbf16>
    %22 = vector.extract_strided_slice %9 {offsets = [0, 256], sizes = [16, 32], strides = [1, 1]} : vector<16x384xf32> to vector<16x32xf32>
    %23 = vector.extract_strided_slice %9 {offsets = [0, 288], sizes = [16, 32], strides = [1, 1]} : vector<16x384xf32> to vector<16x32xf32>
    %24 = vector.extract_strided_slice %9 {offsets = [0, 320], sizes = [16, 32], strides = [1, 1]} : vector<16x384xf32> to vector<16x32xf32>
    %25 = vector.extract_strided_slice %9 {offsets = [0, 352], sizes = [16, 32], strides = [1, 1]} : vector<16x384xf32> to vector<16x32xf32>
    %26 = tpu.concatenate %22, %23, %24, %25 in 0 : vector<16x32xf32>, vector<16x32xf32>, vector<16x32xf32>, vector<16x32xf32> -> vector<64x32xf32>
    %27 = arith.truncf %26 : vector<64x32xf32> to vector<64x32xbf16>
    %cst_9 = arith.constant dense<0.000000e+00> : vector<64x64xf32>
    %28 = tpu.matmul %15, %21, %cst_9 {dimension_numbers = #tpu.dot_dimension_numbers<[1], [1], [0], [0], [0, 0, 1, 0], [], []>} : vector<64x32xbf16>, vector<64x32xbf16>, vector<64x64xf32> -> vector<64x64xf32>
    %29 = arith.addf %28, %1 : vector<64x64xf32>
    %cst_10 = arith.constant dense<0xFF800000> : vector<64xf32>
    %30 = vector.multi_reduction <maximumf>, %29, %cst_10 [1] : vector<64x64xf32> to vector<64xf32>
    %31 = vector.shape_cast %30 : vector<64xf32> to vector<64x1xf32>
    %32 = vector.broadcast %31 : vector<64x1xf32> to vector<64x64xf32>
    %33 = arith.subf %29, %32 : vector<64x64xf32>
    %34 = math.exp %33 : vector<64x64xf32>
    %cst_11 = arith.constant dense<0.000000e+00> : vector<64xf32>
    %35 = vector.multi_reduction <add>, %34, %cst_11 [1] : vector<64x64xf32> to vector<64xf32>
    %36 = vector.shape_cast %35 : vector<64xf32> to vector<64x1xf32>
    %37 = tpu.reciprocal %36 {approx = true} : vector<64x1xf32> -> vector<64x1xf32>
    %38 = vector.broadcast %37 : vector<64x1xf32> to vector<64x64xf32>
    %39 = arith.mulf %34, %38 : vector<64x64xf32>
    %40 = arith.truncf %39 : vector<64x64xf32> to vector<64x64xbf16>
    %cst_12 = arith.constant dense<0.000000e+00> : vector<64x32xf32>
    %41 = tpu.matmul %40, %27, %cst_12 {dimension_numbers = #tpu.dot_dimension_numbers<[1], [0], [0], [1], [0, 0, 1, 1], [], []>} : vector<64x64xbf16>, vector<64x32xbf16>, vector<64x32xf32> -> vector<64x32xf32>
    %42 = vector.extract_strided_slice %41 {offsets = [0, 0], sizes = [16, 32], strides = [1, 1]} : vector<64x32xf32> to vector<16x32xf32>
    %43 = vector.extract_strided_slice %41 {offsets = [16, 0], sizes = [16, 32], strides = [1, 1]} : vector<64x32xf32> to vector<16x32xf32>
    %44 = vector.extract_strided_slice %41 {offsets = [32, 0], sizes = [16, 32], strides = [1, 1]} : vector<64x32xf32> to vector<16x32xf32>
    %45 = vector.extract_strided_slice %41 {offsets = [48, 0], sizes = [16, 32], strides = [1, 1]} : vector<64x32xf32> to vector<16x32xf32>
    %46 = tpu.concatenate %42, %43, %44, %45 in 1 : vector<16x32xf32>, vector<16x32xf32>, vector<16x32xf32>, vector<16x32xf32> -> vector<16x128xf32>
    %47 = arith.truncf %46 : vector<16x128xf32> to vector<16x128xbf16>
    %c0_13 = arith.constant 0 : index
    %c0_14 = arith.constant 0 : index
    %c0_15 = arith.constant 0 : index
    %48 = vector.load %arg4[%c0_13, %c0_14, %c0_15] : memref<2x128x128xbf16, #tpu.memory_space<vmem>>, vector<1x128x128xbf16>
    %49 = vector.shape_cast %48 : vector<1x128x128xbf16> to vector<128x128xbf16>
    %cst_16 = arith.constant dense<0.000000e+00> : vector<16x128xf32>
    %50 = tpu.matmul %47, %49, %cst_16 {dimension_numbers = #tpu.dot_dimension_numbers<[1], [0], [0], [1], [0, 0, 1, 1], [], []>} : vector<16x128xbf16>, vector<128x128xbf16>, vector<16x128xf32> -> vector<16x128xf32>
    %c0_17 = arith.constant 0 : index
    %c0_18 = arith.constant 0 : index
    %c0_19 = arith.constant 0 : index
    %51 = vector.load %arg5[%c0_17, %c0_18, %c0_19] : memref<2x1x128xf32, #tpu.memory_space<vmem>>, vector<1x1x128xf32>
    %52 = vector.shape_cast %51 : vector<1x1x128xf32> to vector<1x128xf32>
    %53 = vector.broadcast %52 : vector<1x128xf32> to vector<16x128xf32>
    %54 = arith.addf %50, %53 : vector<16x128xf32>
    %55 = arith.addf %0, %54 : vector<16x128xf32>
    %c0_20 = arith.constant 0 : index
    %c0_21 = arith.constant 0 : index
    %c0_22 = arith.constant 0 : index
    %56 = vector.load %arg6[%c0_20, %c0_21, %c0_22] : memref<2x1x128xf32, #tpu.memory_space<vmem>>, vector<1x1x128xf32>
    %57 = vector.shape_cast %56 : vector<1x1x128xf32> to vector<1x128xf32>
    %c0_23 = arith.constant 0 : index
    %c0_24 = arith.constant 0 : index
    %c0_25 = arith.constant 0 : index
    %58 = vector.load %arg7[%c0_23, %c0_24, %c0_25] : memref<2x1x128xf32, #tpu.memory_space<vmem>>, vector<1x1x128xf32>
    %59 = vector.shape_cast %58 : vector<1x1x128xf32> to vector<1x128xf32>
    %cst_26 = arith.constant dense<0.000000e+00> : vector<16xf32>
    %60 = vector.multi_reduction <add>, %55, %cst_26 [1] : vector<16x128xf32> to vector<16xf32>
    %61 = vector.shape_cast %60 : vector<16xf32> to vector<16x1xf32>
    %cst_27 = arith.constant 1.280000e+02 : f32
    %62 = vector.broadcast %cst_27 : f32 to vector<16x1xf32>
    %63 = arith.divf %61, %62 : vector<16x1xf32>
    %64 = vector.broadcast %63 : vector<16x1xf32> to vector<16x128xf32>
    %65 = arith.subf %55, %64 : vector<16x128xf32>
    %66 = arith.mulf %65, %65 : vector<16x128xf32>
    %cst_28 = arith.constant dense<0.000000e+00> : vector<16xf32>
    %67 = vector.multi_reduction <add>, %66, %cst_28 [1] : vector<16x128xf32> to vector<16xf32>
    %68 = vector.shape_cast %67 : vector<16xf32> to vector<16x1xf32>
    %cst_29 = arith.constant 1.280000e+02 : f32
    %69 = vector.broadcast %cst_29 : f32 to vector<16x1xf32>
    %70 = arith.divf %68, %69 : vector<16x1xf32>
    %71 = vector.broadcast %63 : vector<16x1xf32> to vector<16x128xf32>
    %72 = arith.subf %55, %71 : vector<16x128xf32>
    %cst_30 = arith.constant 9.99999996E-13 : f32
    %73 = vector.broadcast %cst_30 : f32 to vector<16x1xf32>
    %74 = arith.addf %70, %73 : vector<16x1xf32>
    %75 = math.rsqrt %74 : vector<16x1xf32>
    %76 = vector.broadcast %75 : vector<16x1xf32> to vector<16x128xf32>
    %77 = arith.mulf %72, %76 : vector<16x128xf32>
    %78 = vector.broadcast %57 : vector<1x128xf32> to vector<16x128xf32>
    %79 = arith.mulf %77, %78 : vector<16x128xf32>
    %80 = vector.broadcast %59 : vector<1x128xf32> to vector<16x128xf32>
    %81 = arith.addf %79, %80 : vector<16x128xf32>
    %82 = arith.truncf %81 : vector<16x128xf32> to vector<16x128xbf16>
    %c0_31 = arith.constant 0 : index
    %c0_32 = arith.constant 0 : index
    %c0_33 = arith.constant 0 : index
    %83 = vector.load %arg8[%c0_31, %c0_32, %c0_33] : memref<2x128x256xbf16, #tpu.memory_space<vmem>>, vector<1x128x256xbf16>
    %84 = vector.shape_cast %83 : vector<1x128x256xbf16> to vector<128x256xbf16>
    %cst_34 = arith.constant dense<0.000000e+00> : vector<16x256xf32>
    %85 = tpu.matmul %82, %84, %cst_34 {dimension_numbers = #tpu.dot_dimension_numbers<[1], [0], [0], [1], [0, 0, 1, 1], [], []>} : vector<16x128xbf16>, vector<128x256xbf16>, vector<16x256xf32> -> vector<16x256xf32>
    %c0_35 = arith.constant 0 : index
    %c0_36 = arith.constant 0 : index
    %c0_37 = arith.constant 0 : index
    %86 = vector.load %arg9[%c0_35, %c0_36, %c0_37] : memref<2x1x256xf32, #tpu.memory_space<vmem>>, vector<1x1x256xf32>
    %87 = vector.shape_cast %86 : vector<1x1x256xf32> to vector<1x256xf32>
    %88 = vector.broadcast %87 : vector<1x256xf32> to vector<16x256xf32>
    %89 = arith.addf %85, %88 : vector<16x256xf32>
    %90 = arith.mulf %89, %89 : vector<16x256xf32>
    %91 = arith.mulf %89, %90 : vector<16x256xf32>
    %cst_38 = arith.constant 4.471500e-02 : f32
    %92 = vector.broadcast %cst_38 : f32 to vector<16x256xf32>
    %93 = arith.mulf %92, %91 : vector<16x256xf32>
    %94 = arith.addf %89, %93 : vector<16x256xf32>
    %cst_39 = arith.constant 0.797884583 : f32
    %95 = vector.broadcast %cst_39 : f32 to vector<16x256xf32>
    %96 = arith.mulf %95, %94 : vector<16x256xf32>
    %97 = math.tanh %96 : vector<16x256xf32>
    %cst_40 = arith.constant 1.000000e+00 : f32
    %98 = vector.broadcast %cst_40 : f32 to vector<16x256xf32>
    %99 = arith.addf %98, %97 : vector<16x256xf32>
    %cst_41 = arith.constant 5.000000e-01 : f32
    %100 = vector.broadcast %cst_41 : f32 to vector<16x256xf32>
    %101 = arith.mulf %100, %99 : vector<16x256xf32>
    %102 = arith.mulf %89, %101 : vector<16x256xf32>
    %103 = arith.truncf %102 : vector<16x256xf32> to vector<16x256xbf16>
    %c0_42 = arith.constant 0 : index
    %c0_43 = arith.constant 0 : index
    %c0_44 = arith.constant 0 : index
    %104 = vector.load %arg10[%c0_42, %c0_43, %c0_44] : memref<2x256x128xbf16, #tpu.memory_space<vmem>>, vector<1x256x128xbf16>
    %105 = vector.shape_cast %104 : vector<1x256x128xbf16> to vector<256x128xbf16>
    %cst_45 = arith.constant dense<0.000000e+00> : vector<16x128xf32>
    %106 = tpu.matmul %103, %105, %cst_45 {dimension_numbers = #tpu.dot_dimension_numbers<[1], [0], [0], [1], [0, 0, 1, 1], [], []>} : vector<16x256xbf16>, vector<256x128xbf16>, vector<16x128xf32> -> vector<16x128xf32>
    %c0_46 = arith.constant 0 : index
    %c0_47 = arith.constant 0 : index
    %c0_48 = arith.constant 0 : index
    %107 = vector.load %arg11[%c0_46, %c0_47, %c0_48] : memref<2x1x128xf32, #tpu.memory_space<vmem>>, vector<1x1x128xf32>
    %108 = vector.shape_cast %107 : vector<1x1x128xf32> to vector<1x128xf32>
    %109 = vector.broadcast %108 : vector<1x128xf32> to vector<16x128xf32>
    %110 = arith.addf %106, %109 : vector<16x128xf32>
    %111 = arith.addf %81, %110 : vector<16x128xf32>
    %c0_49 = arith.constant 0 : index
    %c0_50 = arith.constant 0 : index
    %c0_51 = arith.constant 0 : index
    %112 = vector.load %arg12[%c0_49, %c0_50, %c0_51] : memref<2x1x128xf32, #tpu.memory_space<vmem>>, vector<1x1x128xf32>
    %113 = vector.shape_cast %112 : vector<1x1x128xf32> to vector<1x128xf32>
    %c0_52 = arith.constant 0 : index
    %c0_53 = arith.constant 0 : index
    %c0_54 = arith.constant 0 : index
    %114 = vector.load %arg13[%c0_52, %c0_53, %c0_54] : memref<2x1x128xf32, #tpu.memory_space<vmem>>, vector<1x1x128xf32>
    %115 = vector.shape_cast %114 : vector<1x1x128xf32> to vector<1x128xf32>
    %cst_55 = arith.constant dense<0.000000e+00> : vector<16xf32>
    %116 = vector.multi_reduction <add>, %111, %cst_55 [1] : vector<16x128xf32> to vector<16xf32>
    %117 = vector.shape_cast %116 : vector<16xf32> to vector<16x1xf32>
    %cst_56 = arith.constant 1.280000e+02 : f32
    %118 = vector.broadcast %cst_56 : f32 to vector<16x1xf32>
    %119 = arith.divf %117, %118 : vector<16x1xf32>
    %120 = vector.broadcast %119 : vector<16x1xf32> to vector<16x128xf32>
    %121 = arith.subf %111, %120 : vector<16x128xf32>
    %122 = arith.mulf %121, %121 : vector<16x128xf32>
    %cst_57 = arith.constant dense<0.000000e+00> : vector<16xf32>
    %123 = vector.multi_reduction <add>, %122, %cst_57 [1] : vector<16x128xf32> to vector<16xf32>
    %124 = vector.shape_cast %123 : vector<16xf32> to vector<16x1xf32>
    %cst_58 = arith.constant 1.280000e+02 : f32
    %125 = vector.broadcast %cst_58 : f32 to vector<16x1xf32>
    %126 = arith.divf %124, %125 : vector<16x1xf32>
    %127 = vector.broadcast %119 : vector<16x1xf32> to vector<16x128xf32>
    %128 = arith.subf %111, %127 : vector<16x128xf32>
    %cst_59 = arith.constant 9.99999996E-13 : f32
    %129 = vector.broadcast %cst_59 : f32 to vector<16x1xf32>
    %130 = arith.addf %126, %129 : vector<16x1xf32>
    %131 = math.rsqrt %130 : vector<16x1xf32>
    %132 = vector.broadcast %131 : vector<16x1xf32> to vector<16x128xf32>
    %133 = arith.mulf %128, %132 : vector<16x128xf32>
    %134 = vector.broadcast %113 : vector<1x128xf32> to vector<16x128xf32>
    %135 = arith.mulf %133, %134 : vector<16x128xf32>
    %136 = vector.broadcast %115 : vector<1x128xf32> to vector<16x128xf32>
    %137 = arith.addf %135, %136 : vector<16x128xf32>
    %138 = arith.truncf %137 : vector<16x128xf32> to vector<16x128xbf16>
    %c1 = arith.constant 1 : index
    %c0_60 = arith.constant 0 : index
    %c0_61 = arith.constant 0 : index
    %139 = vector.load %arg2[%c1, %c0_60, %c0_61] : memref<2x128x384xbf16, #tpu.memory_space<vmem>>, vector<1x128x384xbf16>
    %140 = vector.shape_cast %139 : vector<1x128x384xbf16> to vector<128x384xbf16>
    %cst_62 = arith.constant dense<0.000000e+00> : vector<16x384xf32>
    %141 = tpu.matmul %138, %140, %cst_62 {dimension_numbers = #tpu.dot_dimension_numbers<[1], [0], [0], [1], [0, 0, 1, 1], [], []>} : vector<16x128xbf16>, vector<128x384xbf16>, vector<16x384xf32> -> vector<16x384xf32>
    %c1_63 = arith.constant 1 : index
    %c0_64 = arith.constant 0 : index
    %c0_65 = arith.constant 0 : index
    %142 = vector.load %arg3[%c1_63, %c0_64, %c0_65] : memref<2x1x384xf32, #tpu.memory_space<vmem>>, vector<1x1x384xf32>
    %143 = vector.shape_cast %142 : vector<1x1x384xf32> to vector<1x384xf32>
    %144 = vector.broadcast %143 : vector<1x384xf32> to vector<16x384xf32>
    %145 = arith.addf %141, %144 : vector<16x384xf32>
    %146 = vector.extract_strided_slice %145 {offsets = [0, 0], sizes = [16, 32], strides = [1, 1]} : vector<16x384xf32> to vector<16x32xf32>
    %147 = vector.extract_strided_slice %145 {offsets = [0, 32], sizes = [16, 32], strides = [1, 1]} : vector<16x384xf32> to vector<16x32xf32>
    %148 = vector.extract_strided_slice %145 {offsets = [0, 64], sizes = [16, 32], strides = [1, 1]} : vector<16x384xf32> to vector<16x32xf32>
    %149 = vector.extract_strided_slice %145 {offsets = [0, 96], sizes = [16, 32], strides = [1, 1]} : vector<16x384xf32> to vector<16x32xf32>
    %150 = tpu.concatenate %146, %147, %148, %149 in 0 : vector<16x32xf32>, vector<16x32xf32>, vector<16x32xf32>, vector<16x32xf32> -> vector<64x32xf32>
    %151 = arith.truncf %150 : vector<64x32xf32> to vector<64x32xbf16>
    %152 = vector.extract_strided_slice %145 {offsets = [0, 128], sizes = [16, 32], strides = [1, 1]} : vector<16x384xf32> to vector<16x32xf32>
    %153 = vector.extract_strided_slice %145 {offsets = [0, 160], sizes = [16, 32], strides = [1, 1]} : vector<16x384xf32> to vector<16x32xf32>
    %154 = vector.extract_strided_slice %145 {offsets = [0, 192], sizes = [16, 32], strides = [1, 1]} : vector<16x384xf32> to vector<16x32xf32>
    %155 = vector.extract_strided_slice %145 {offsets = [0, 224], sizes = [16, 32], strides = [1, 1]} : vector<16x384xf32> to vector<16x32xf32>
    %156 = tpu.concatenate %152, %153, %154, %155 in 0 : vector<16x32xf32>, vector<16x32xf32>, vector<16x32xf32>, vector<16x32xf32> -> vector<64x32xf32>
    %157 = arith.truncf %156 : vector<64x32xf32> to vector<64x32xbf16>
    %158 = vector.extract_strided_slice %145 {offsets = [0, 256], sizes = [16, 32], strides = [1, 1]} : vector<16x384xf32> to vector<16x32xf32>
    %159 = vector.extract_strided_slice %145 {offsets = [0, 288], sizes = [16, 32], strides = [1, 1]} : vector<16x384xf32> to vector<16x32xf32>
    %160 = vector.extract_strided_slice %145 {offsets = [0, 320], sizes = [16, 32], strides = [1, 1]} : vector<16x384xf32> to vector<16x32xf32>
    %161 = vector.extract_strided_slice %145 {offsets = [0, 352], sizes = [16, 32], strides = [1, 1]} : vector<16x384xf32> to vector<16x32xf32>
    %162 = tpu.concatenate %158, %159, %160, %161 in 0 : vector<16x32xf32>, vector<16x32xf32>, vector<16x32xf32>, vector<16x32xf32> -> vector<64x32xf32>
    %163 = arith.truncf %162 : vector<64x32xf32> to vector<64x32xbf16>
    %cst_66 = arith.constant dense<0.000000e+00> : vector<64x64xf32>
    %164 = tpu.matmul %151, %157, %cst_66 {dimension_numbers = #tpu.dot_dimension_numbers<[1], [1], [0], [0], [0, 0, 1, 0], [], []>} : vector<64x32xbf16>, vector<64x32xbf16>, vector<64x64xf32> -> vector<64x64xf32>
    %165 = arith.addf %164, %1 : vector<64x64xf32>
    %cst_67 = arith.constant dense<0xFF800000> : vector<64xf32>
    %166 = vector.multi_reduction <maximumf>, %165, %cst_67 [1] : vector<64x64xf32> to vector<64xf32>
    %167 = vector.shape_cast %166 : vector<64xf32> to vector<64x1xf32>
    %168 = vector.broadcast %167 : vector<64x1xf32> to vector<64x64xf32>
    %169 = arith.subf %165, %168 : vector<64x64xf32>
    %170 = math.exp %169 : vector<64x64xf32>
    %cst_68 = arith.constant dense<0.000000e+00> : vector<64xf32>
    %171 = vector.multi_reduction <add>, %170, %cst_68 [1] : vector<64x64xf32> to vector<64xf32>
    %172 = vector.shape_cast %171 : vector<64xf32> to vector<64x1xf32>
    %173 = tpu.reciprocal %172 {approx = true} : vector<64x1xf32> -> vector<64x1xf32>
    %174 = vector.broadcast %173 : vector<64x1xf32> to vector<64x64xf32>
    %175 = arith.mulf %170, %174 : vector<64x64xf32>
    %176 = arith.truncf %175 : vector<64x64xf32> to vector<64x64xbf16>
    %cst_69 = arith.constant dense<0.000000e+00> : vector<64x32xf32>
    %177 = tpu.matmul %176, %163, %cst_69 {dimension_numbers = #tpu.dot_dimension_numbers<[1], [0], [0], [1], [0, 0, 1, 1], [], []>} : vector<64x64xbf16>, vector<64x32xbf16>, vector<64x32xf32> -> vector<64x32xf32>
    %178 = vector.extract_strided_slice %177 {offsets = [0, 0], sizes = [16, 32], strides = [1, 1]} : vector<64x32xf32> to vector<16x32xf32>
    %179 = vector.extract_strided_slice %177 {offsets = [16, 0], sizes = [16, 32], strides = [1, 1]} : vector<64x32xf32> to vector<16x32xf32>
    %180 = vector.extract_strided_slice %177 {offsets = [32, 0], sizes = [16, 32], strides = [1, 1]} : vector<64x32xf32> to vector<16x32xf32>
    %181 = vector.extract_strided_slice %177 {offsets = [48, 0], sizes = [16, 32], strides = [1, 1]} : vector<64x32xf32> to vector<16x32xf32>
    %182 = tpu.concatenate %178, %179, %180, %181 in 1 : vector<16x32xf32>, vector<16x32xf32>, vector<16x32xf32>, vector<16x32xf32> -> vector<16x128xf32>
    %183 = arith.truncf %182 : vector<16x128xf32> to vector<16x128xbf16>
    %c1_70 = arith.constant 1 : index
    %c0_71 = arith.constant 0 : index
    %c0_72 = arith.constant 0 : index
    %184 = vector.load %arg4[%c1_70, %c0_71, %c0_72] : memref<2x128x128xbf16, #tpu.memory_space<vmem>>, vector<1x128x128xbf16>
    %185 = vector.shape_cast %184 : vector<1x128x128xbf16> to vector<128x128xbf16>
    %cst_73 = arith.constant dense<0.000000e+00> : vector<16x128xf32>
    %186 = tpu.matmul %183, %185, %cst_73 {dimension_numbers = #tpu.dot_dimension_numbers<[1], [0], [0], [1], [0, 0, 1, 1], [], []>} : vector<16x128xbf16>, vector<128x128xbf16>, vector<16x128xf32> -> vector<16x128xf32>
    %c1_74 = arith.constant 1 : index
    %c0_75 = arith.constant 0 : index
    %c0_76 = arith.constant 0 : index
    %187 = vector.load %arg5[%c1_74, %c0_75, %c0_76] : memref<2x1x128xf32, #tpu.memory_space<vmem>>, vector<1x1x128xf32>
    %188 = vector.shape_cast %187 : vector<1x1x128xf32> to vector<1x128xf32>
    %189 = vector.broadcast %188 : vector<1x128xf32> to vector<16x128xf32>
    %190 = arith.addf %186, %189 : vector<16x128xf32>
    %191 = arith.addf %137, %190 : vector<16x128xf32>
    %c1_77 = arith.constant 1 : index
    %c0_78 = arith.constant 0 : index
    %c0_79 = arith.constant 0 : index
    %192 = vector.load %arg6[%c1_77, %c0_78, %c0_79] : memref<2x1x128xf32, #tpu.memory_space<vmem>>, vector<1x1x128xf32>
    %193 = vector.shape_cast %192 : vector<1x1x128xf32> to vector<1x128xf32>
    %c1_80 = arith.constant 1 : index
    %c0_81 = arith.constant 0 : index
    %c0_82 = arith.constant 0 : index
    %194 = vector.load %arg7[%c1_80, %c0_81, %c0_82] : memref<2x1x128xf32, #tpu.memory_space<vmem>>, vector<1x1x128xf32>
    %195 = vector.shape_cast %194 : vector<1x1x128xf32> to vector<1x128xf32>
    %cst_83 = arith.constant dense<0.000000e+00> : vector<16xf32>
    %196 = vector.multi_reduction <add>, %191, %cst_83 [1] : vector<16x128xf32> to vector<16xf32>
    %197 = vector.shape_cast %196 : vector<16xf32> to vector<16x1xf32>
    %cst_84 = arith.constant 1.280000e+02 : f32
    %198 = vector.broadcast %cst_84 : f32 to vector<16x1xf32>
    %199 = arith.divf %197, %198 : vector<16x1xf32>
    %200 = vector.broadcast %199 : vector<16x1xf32> to vector<16x128xf32>
    %201 = arith.subf %191, %200 : vector<16x128xf32>
    %202 = arith.mulf %201, %201 : vector<16x128xf32>
    %cst_85 = arith.constant dense<0.000000e+00> : vector<16xf32>
    %203 = vector.multi_reduction <add>, %202, %cst_85 [1] : vector<16x128xf32> to vector<16xf32>
    %204 = vector.shape_cast %203 : vector<16xf32> to vector<16x1xf32>
    %cst_86 = arith.constant 1.280000e+02 : f32
    %205 = vector.broadcast %cst_86 : f32 to vector<16x1xf32>
    %206 = arith.divf %204, %205 : vector<16x1xf32>
    %207 = vector.broadcast %199 : vector<16x1xf32> to vector<16x128xf32>
    %208 = arith.subf %191, %207 : vector<16x128xf32>
    %cst_87 = arith.constant 9.99999996E-13 : f32
    %209 = vector.broadcast %cst_87 : f32 to vector<16x1xf32>
    %210 = arith.addf %206, %209 : vector<16x1xf32>
    %211 = math.rsqrt %210 : vector<16x1xf32>
    %212 = vector.broadcast %211 : vector<16x1xf32> to vector<16x128xf32>
    %213 = arith.mulf %208, %212 : vector<16x128xf32>
    %214 = vector.broadcast %193 : vector<1x128xf32> to vector<16x128xf32>
    %215 = arith.mulf %213, %214 : vector<16x128xf32>
    %216 = vector.broadcast %195 : vector<1x128xf32> to vector<16x128xf32>
    %217 = arith.addf %215, %216 : vector<16x128xf32>
    %218 = arith.truncf %217 : vector<16x128xf32> to vector<16x128xbf16>
    %c1_88 = arith.constant 1 : index
    %c0_89 = arith.constant 0 : index
    %c0_90 = arith.constant 0 : index
    %219 = vector.load %arg8[%c1_88, %c0_89, %c0_90] : memref<2x128x256xbf16, #tpu.memory_space<vmem>>, vector<1x128x256xbf16>
    %220 = vector.shape_cast %219 : vector<1x128x256xbf16> to vector<128x256xbf16>
    %cst_91 = arith.constant dense<0.000000e+00> : vector<16x256xf32>
    %221 = tpu.matmul %218, %220, %cst_91 {dimension_numbers = #tpu.dot_dimension_numbers<[1], [0], [0], [1], [0, 0, 1, 1], [], []>} : vector<16x128xbf16>, vector<128x256xbf16>, vector<16x256xf32> -> vector<16x256xf32>
    %c1_92 = arith.constant 1 : index
    %c0_93 = arith.constant 0 : index
    %c0_94 = arith.constant 0 : index
    %222 = vector.load %arg9[%c1_92, %c0_93, %c0_94] : memref<2x1x256xf32, #tpu.memory_space<vmem>>, vector<1x1x256xf32>
    %223 = vector.shape_cast %222 : vector<1x1x256xf32> to vector<1x256xf32>
    %224 = vector.broadcast %223 : vector<1x256xf32> to vector<16x256xf32>
    %225 = arith.addf %221, %224 : vector<16x256xf32>
    %226 = arith.mulf %225, %225 : vector<16x256xf32>
    %227 = arith.mulf %225, %226 : vector<16x256xf32>
    %cst_95 = arith.constant 4.471500e-02 : f32
    %228 = vector.broadcast %cst_95 : f32 to vector<16x256xf32>
    %229 = arith.mulf %228, %227 : vector<16x256xf32>
    %230 = arith.addf %225, %229 : vector<16x256xf32>
    %cst_96 = arith.constant 0.797884583 : f32
    %231 = vector.broadcast %cst_96 : f32 to vector<16x256xf32>
    %232 = arith.mulf %231, %230 : vector<16x256xf32>
    %233 = math.tanh %232 : vector<16x256xf32>
    %cst_97 = arith.constant 1.000000e+00 : f32
    %234 = vector.broadcast %cst_97 : f32 to vector<16x256xf32>
    %235 = arith.addf %234, %233 : vector<16x256xf32>
    %cst_98 = arith.constant 5.000000e-01 : f32
    %236 = vector.broadcast %cst_98 : f32 to vector<16x256xf32>
    %237 = arith.mulf %236, %235 : vector<16x256xf32>
    %238 = arith.mulf %225, %237 : vector<16x256xf32>
    %239 = arith.truncf %238 : vector<16x256xf32> to vector<16x256xbf16>
    %c1_99 = arith.constant 1 : index
    %c0_100 = arith.constant 0 : index
    %c0_101 = arith.constant 0 : index
    %240 = vector.load %arg10[%c1_99, %c0_100, %c0_101] : memref<2x256x128xbf16, #tpu.memory_space<vmem>>, vector<1x256x128xbf16>
    %241 = vector.shape_cast %240 : vector<1x256x128xbf16> to vector<256x128xbf16>
    %cst_102 = arith.constant dense<0.000000e+00> : vector<16x128xf32>
    %242 = tpu.matmul %239, %241, %cst_102 {dimension_numbers = #tpu.dot_dimension_numbers<[1], [0], [0], [1], [0, 0, 1, 1], [], []>} : vector<16x256xbf16>, vector<256x128xbf16>, vector<16x128xf32> -> vector<16x128xf32>
    %c1_103 = arith.constant 1 : index
    %c0_104 = arith.constant 0 : index
    %c0_105 = arith.constant 0 : index
    %243 = vector.load %arg11[%c1_103, %c0_104, %c0_105] : memref<2x1x128xf32, #tpu.memory_space<vmem>>, vector<1x1x128xf32>
    %244 = vector.shape_cast %243 : vector<1x1x128xf32> to vector<1x128xf32>
    %245 = vector.broadcast %244 : vector<1x128xf32> to vector<16x128xf32>
    %246 = arith.addf %242, %245 : vector<16x128xf32>
    %247 = arith.addf %217, %246 : vector<16x128xf32>
    %c1_106 = arith.constant 1 : index
    %c0_107 = arith.constant 0 : index
    %c0_108 = arith.constant 0 : index
    %248 = vector.load %arg12[%c1_106, %c0_107, %c0_108] : memref<2x1x128xf32, #tpu.memory_space<vmem>>, vector<1x1x128xf32>
    %249 = vector.shape_cast %248 : vector<1x1x128xf32> to vector<1x128xf32>
    %c1_109 = arith.constant 1 : index
    %c0_110 = arith.constant 0 : index
    %c0_111 = arith.constant 0 : index
    %250 = vector.load %arg13[%c1_109, %c0_110, %c0_111] : memref<2x1x128xf32, #tpu.memory_space<vmem>>, vector<1x1x128xf32>
    %251 = vector.shape_cast %250 : vector<1x1x128xf32> to vector<1x128xf32>
    %cst_112 = arith.constant dense<0.000000e+00> : vector<16xf32>
    %252 = vector.multi_reduction <add>, %247, %cst_112 [1] : vector<16x128xf32> to vector<16xf32>
    %253 = vector.shape_cast %252 : vector<16xf32> to vector<16x1xf32>
    %cst_113 = arith.constant 1.280000e+02 : f32
    %254 = vector.broadcast %cst_113 : f32 to vector<16x1xf32>
    %255 = arith.divf %253, %254 : vector<16x1xf32>
    %256 = vector.broadcast %255 : vector<16x1xf32> to vector<16x128xf32>
    %257 = arith.subf %247, %256 : vector<16x128xf32>
    %258 = arith.mulf %257, %257 : vector<16x128xf32>
    %cst_114 = arith.constant dense<0.000000e+00> : vector<16xf32>
    %259 = vector.multi_reduction <add>, %258, %cst_114 [1] : vector<16x128xf32> to vector<16xf32>
    %260 = vector.shape_cast %259 : vector<16xf32> to vector<16x1xf32>
    %cst_115 = arith.constant 1.280000e+02 : f32
    %261 = vector.broadcast %cst_115 : f32 to vector<16x1xf32>
    %262 = arith.divf %260, %261 : vector<16x1xf32>
    %263 = vector.broadcast %255 : vector<16x1xf32> to vector<16x128xf32>
    %264 = arith.subf %247, %263 : vector<16x128xf32>
    %cst_116 = arith.constant 9.99999996E-13 : f32
    %265 = vector.broadcast %cst_116 : f32 to vector<16x1xf32>
    %266 = arith.addf %262, %265 : vector<16x1xf32>
    %267 = math.rsqrt %266 : vector<16x1xf32>
    %268 = vector.broadcast %267 : vector<16x1xf32> to vector<16x128xf32>
    %269 = arith.mulf %264, %268 : vector<16x128xf32>
    %270 = vector.broadcast %249 : vector<1x128xf32> to vector<16x128xf32>
    %271 = arith.mulf %269, %270 : vector<16x128xf32>
    %272 = vector.broadcast %251 : vector<1x128xf32> to vector<16x128xf32>
    %273 = arith.addf %271, %272 : vector<16x128xf32>
    %c0_117 = arith.constant 0 : index
    %c0_118 = arith.constant 0 : index
    %274 = vector.load %arg14[%c0_117, %c0_118] : memref<16x128xf32, #tpu.memory_space<vmem>>, vector<16x128xf32>
    tpu.vector_store %arg14[%c0_117, %c0_118], %273 {strides = array<i32>} : memref<16x128xf32, #tpu.memory_space<vmem>>, vector<16x128xf32>,
    return
  }
}

</mosaic_0001>

<bundles_post_ra>
// kernel: tpu_custom_call.1
= control target key start
LH: loop header
LB: loop body
LE: loop exit
PB: predicated region body
PF: predicated region fallthrough
CT: control target
= control target key end

     0   :  { %19 = vsyncpa [#allocation3], 0  ;;  %s4035_s0 = inlined_call_operand.hbm [shape: f32[16,128], index: 0, kind: input, shape index: {}]   ;;  %s4036_s1 = inlined_call_operand.hbm [shape: f32[64,64], index: 1, kind: input, shape index: {}]   ;;  %s4037_s2 = inlined_call_operand.hbm [shape: bf16[2,128,384], index: 2, kind: input, shape index: {}]   ;;  %s4038_s3 = inlined_call_operand.vmem [shape: f32[2,1,384], index: 3, kind: input, shape index: {}]   ;;  %s4039_s4 = inlined_call_operand.hbm [shape: bf16[2,128,128], index: 4, kind: input, shape index: {}]   ;;  %s4040_s5 = inlined_call_operand.vmem [shape: f32[2,1,128], index: 5, kind: input, shape index: {}]   ;;  %s4041_s6 = inlined_call_operand.vmem [shape: f32[2,1,128], index: 6, kind: input, shape index: {}]   ;;  %s4042_s7 = inlined_call_operand.vmem [shape: f32[2,1,128], index: 7, kind: input, shape index: {}]   ;;  %s4043_s8 = inlined_call_operand.hbm [shape: bf16[2,128,256], index: 8, kind: input, shape index: {}]   ;;  %s4044_s9 = inlined_call_operand.vmem [shape: f32[2,1,256], index: 9, kind: input, shape index: {}]   ;;  %s4045_s10 = inlined_call_operand.hbm [shape: bf16[2,256,128], index: 10, kind: input, shape index: {}]   ;;  %s4046_s11 = inlined_call_operand.vmem [shape: f32[2,1,128], index: 11, kind: input, shape index: {}]   ;;  %s4047_s12 = inlined_call_operand.vmem [shape: f32[2,1,128], index: 12, kind: input, shape index: {}]   ;;  %s4048_s13 = inlined_call_operand.vmem [shape: f32[2,1,128], index: 13, kind: input, shape index: {}]   ;;  %s4049_s14 = inlined_call_operand.hbm [shape: f32[16,128], index: 14, kind: output, shape index: {}]  }
   0x1   :  { %20 = vsyncpa [#allocation6], 0 }
   0x2   :  { %21 = vsyncpa [#allocation9], 0 }
   0x3   :  { %22 = vsyncpa [#allocation12], 0 }
   0x4   :  { %23 = vsyncpa [#allocation4], 0  ;;  %s3543_s29 = smov [#allocation5]   ;;  %s3544_s15 = smov [#allocation8]  }
   0x5   :  { %s41_s30 = sshll.u32 %s3543_s29, 4  ;;  %s67_s16 = sshll.u32 %s3544_s15, 4  ;;  %s42_s30 = int_to_ptr.vmem [resolvable:$true] %s41_s30  ;;  %s3636_s16 = int_to_ptr.vmem [resolvable:$true] %s67_s16 }
   0x6   :  { %s3379_s19 = scalar_lea.hbm %s4036_s1, 1024 }
   0x7   :  { %p3380_p0 = scmp.ne.s32.totalorder %s4036_s1, %s3379_s19  ;;  %p3383_p1 = scmp.lt.u32.totalorder %s3379_s19, %s4036_s1 }
   0x9   :  { %p3385_p2 = pnand %p3383_p1, %p3380_p0 }
   0xb   :  { %3388 = shalt.err (!%p3385_p2)
}
   0xc   :  { %s3389_s24 = scalar_lea.vmem %s42_s30, 1024  ;;  %p3394_p4 = scmp.lt.s32.totalorder %s42_s30, %s42_s30 }
   0xd   :  { %p3390_p3 = scmp.ne.s32.totalorder %s42_s30, %s3389_s24  ;;  %p3395_p5 = scmp.lt.s32.totalorder %s3389_s24, %s3389_s24 }
   0xf   :  { %p3396_p6 = por %p3395_p5, %p3394_p4 }
  0x11   :  { %p3397_p7 = pnand %p3396_p6, %p3390_p3 }
  0x13   :  { %3400 = shalt.err (!%p3397_p7)
}
  0x14   :  { %s4050_s25 = smov 128   ;;  %s3546_s26 = smov 8  }
  0x15   :  { %47 = dma.hbm_to_vmem [thread:$0]  %s4036_s1, 1024, %s42_s30, [#allocation6], %s4050_s25, %s4050_s25, %s3546_s26  }
  0x16   :  { %s3401_s17 = scalar_lea.hbm %s4039_s4, 2048 }
  0x17   :  { %p3402_p8 = scmp.ne.s32.totalorder %s4039_s4, %s3401_s17  ;;  %p3405_p9 = scmp.lt.u32.totalorder %s3401_s17, %s4039_s4 }
  0x19   :  { %p3407_p10 = pnand %p3405_p9, %p3402_p8 }
  0x1b   :  { %3410 = shalt.err (!%p3407_p10)
}
  0x1c   :  { %s3411_s22 = scalar_lea.vmem %s3636_s16, 2048  ;;  %p3416_p12 = scmp.lt.s32.totalorder %s3636_s16, %s3636_s16 }
  0x1d   :  { %p3412_p11 = scmp.ne.s32.totalorder %s3636_s16, %s3411_s22  ;;  %p3417_p13 = scmp.lt.s32.totalorder %s3411_s22, %s3411_s22 }
  0x1f   :  { %p3418_p0 = por %p3417_p13, %p3416_p12 }
  0x21   :  { %p3419_p1 = pnand %p3418_p0, %p3412_p11 }
  0x23   :  { %3422 = shalt.err (!%p3419_p1)
}
  0x24   :  { %s4052_s1 = smov 64   ;;  %s3548_s30 = smov 4  }
  0x25   :  { %73 = dma.hbm_to_vmem [thread:$0]  %s4039_s4, 2048, %s3636_s16, [#allocation9], %s4052_s1, %s4052_s1, %s3548_s30  }
  0x26   :  { %s3549_s27 = smov [#allocation2]   ;;  %s3550_s29 = smov [#allocation7]  }
  0x27   :  { %s29_s28 = sshll.u32 %s3549_s27, 4  ;;  %s53_s15 = sshll.u32 %s3550_s29, 4  ;;  %s30_s28 = int_to_ptr.vmem [resolvable:$true] %s29_s28  ;;  %s3673_s15 = int_to_ptr.vmem [resolvable:$true] %s53_s15 }
  0x28   :  { %s3423_s19 = scalar_lea.hbm %s4035_s0, 256 }
  0x29   :  { %p3424_p2 = scmp.ne.s32.totalorder %s4035_s0, %s3423_s19  ;;  %p3427_p3 = scmp.lt.u32.totalorder %s3423_s19, %s4035_s0 }
  0x2b   :  { %p3429_p4 = pnand %p3427_p3, %p3424_p2 }
  0x2d   :  { %3432 = shalt.err (!%p3429_p4)
}
  0x2e   :  { %s3433_s4 = scalar_lea.vmem %s30_s28, 256  ;;  %p3438_p6 = scmp.lt.s32.totalorder %s30_s28, %s30_s28 }
  0x2f   :  { %p3434_p5 = scmp.ne.s32.totalorder %s30_s28, %s3433_s4  ;;  %p3439_p7 = scmp.lt.s32.totalorder %s3433_s4, %s3433_s4 }
  0x31   :  { %p3440_p8 = por %p3439_p7, %p3438_p6 }
  0x33   :  { %p3441_p9 = pnand %p3440_p8, %p3434_p5 }
  0x35   :  { %3444 = shalt.err (!%p3441_p9)
}
  0x36   :  { %s4054_s16 = smov 128   ;;  %s3445_s25 = scalar_lea.hbm %s4037_s2, 6144 }
  0x37   :  { %35 = dma.hbm_to_vmem [thread:$0]  %s4035_s0, 256, %s30_s28, [#allocation3], %s4054_s16, %s4054_s16, %s3546_s26  }
  0x38   :  { %p3446_p10 = scmp.ne.s32.totalorder %s4037_s2, %s3445_s25  ;;  %p3449_p11 = scmp.lt.u32.totalorder %s3445_s25, %s4037_s2 }
  0x3a   :  { %p3451_p12 = pnand %p3449_p11, %p3446_p10 }
  0x3c   :  { %3454 = shalt.err (!%p3451_p12)
}
  0x3d   :  { %s3455_s21 = scalar_lea.vmem %s3673_s15, 6144  ;;  %p3460_p0 = scmp.lt.s32.totalorder %s3673_s15, %s3673_s15 }
  0x3e   :  { %p3456_p13 = scmp.ne.s32.totalorder %s3673_s15, %s3455_s21  ;;  %p3461_p1 = scmp.lt.s32.totalorder %s3455_s21, %s3455_s21 }
  0x40   :  { %p3462_p2 = por %p3461_p1, %p3460_p0 }
  0x42   :  { %p3463_p3 = pnand %p3462_p2, %p3456_p13 }
  0x44   :  { %3466 = shalt.err (!%p3463_p3)
}
  0x45   :  { %s3551_s0 = smov 192   ;;  %s3552_s28 = smov 12  }
  0x46   :  { %59 = dma.hbm_to_vmem [thread:$0]  %s4037_s2, 6144, %s3673_s15, [#allocation6], %s3551_s0, %s3551_s0, %s3552_s28  }
  0x47   :  { %s3553_s23 = smov [#allocation10]   ;;  %s3554_s27 = smov [#allocation11]  }
  0x48   :  { %s85_s24 = sshll.u32 %s3553_s23, 4  ;;  %s99_s29 = sshll.u32 %s3554_s27, 4  ;;  %s86_s24 = int_to_ptr.vmem [resolvable:$true] %s85_s24  ;;  %s3707_s29 = int_to_ptr.vmem [resolvable:$true] %s99_s29 }
  0x49   :  { %s3467_s18 = scalar_lea.hbm %s4043_s8, 4096 }
  0x4a   :  { %p3468_p4 = scmp.ne.s32.totalorder %s4043_s8, %s3467_s18  ;;  %p3471_p5 = scmp.lt.u32.totalorder %s3467_s18, %s4043_s8 }
  0x4c   :  { %p3473_p6 = pnand %p3471_p5, %p3468_p4 }
  0x4e   :  { %3476 = shalt.err (!%p3473_p6)
}
  0x4f   :  { %s3477_s2 = scalar_lea.vmem %s86_s24, 4096  ;;  %p3482_p8 = scmp.lt.s32.totalorder %s86_s24, %s86_s24 }
  0x50   :  { %p3478_p7 = scmp.ne.s32.totalorder %s86_s24, %s3477_s2  ;;  %p3483_p9 = scmp.lt.s32.totalorder %s3477_s2, %s3477_s2 }
  0x52   :  { %p3484_p10 = por %p3483_p9, %p3482_p8 }
  0x54   :  { %p3485_p11 = pnand %p3484_p10, %p3478_p7 }
  0x56   :  { %3488 = shalt.err (!%p3485_p11)
}
  0x57   :  { %91 = dma.hbm_to_vmem [thread:$0]  %s4043_s8, 4096, %s86_s24, [#allocation9], %s4054_s16, %s4054_s16, %s3546_s26  }
  0x58   :  { %s3489_s1 = scalar_lea.hbm %s4045_s10, 4096 }
  0x59   :  { %p3490_p12 = scmp.ne.s32.totalorder %s4045_s10, %s3489_s1  ;;  %p3493_p13 = scmp.lt.u32.totalorder %s3489_s1, %s4045_s10 }
  0x5b   :  { %p3495_p0 = pnand %p3493_p13, %p3490_p12 }
  0x5d   :  { %3498 = shalt.err (!%p3495_p0)
}
  0x5e   :  { %s3499_s17 = scalar_lea.vmem %s3707_s29, 4096  ;;  %p3504_p2 = scmp.lt.s32.totalorder %s3707_s29, %s3707_s29 }
  0x5f   :  { %p3500_p1 = scmp.ne.s32.totalorder %s3707_s29, %s3499_s17  ;;  %p3505_p3 = scmp.lt.s32.totalorder %s3499_s17, %s3499_s17 }
  0x61   :  { %p3506_p4 = por %p3505_p3, %p3504_p2 }
  0x63   :  { %p3507_p5 = pnand %p3506_p4, %p3500_p1 }
  0x65   :  { %3510 = shalt.err (!%p3507_p5)
}
  0x66   :  { %s4055_s8 = smov 64  }
  0x67   :  { %105 = dma.hbm_to_vmem [thread:$0]  %s4045_s10, 4096, %s3707_s29, [#allocation12], %s4055_s8, %s4055_s8, %s3548_s30  }
  0x68   :  { %3533 = dma.done.wait [#allocation3], 256  }
  0x69   :  { %3534 = vsyncadd [#allocation3], 4294967040 }
  0x6a   :  { %3535 = dma.done.wait [#allocation6], 7168  }
  0x6b   :  { %3536 = vsyncadd [#allocation6], 4294960128 }
  0x6c   :  { %3537 = dma.done.wait [#allocation9], 6144  }
  0x6d   :  { %3538 = vsyncadd [#allocation9], 4294961152 }
  0x6e   :  { %3539 = dma.done.wait [#allocation12], 4096  }
  0x6f   :  { %3540 = vsyncadd [#allocation12], 4294963200  ;;  %v3555_v0 = vmov 0   ;;  %v3115_v1 = vld [vmem:[#allocation7 + $0x4] ss:$12 sps:$4 sm:$0xff]   ;;  %v3747_v18 = vld [vmem:[#allocation2 + $0x8] sm:$0xff]  ;;  %v176_v20 = vlaneseq }
  0x70   :  { %351 = vmatprep.mubr.bf16.mxu0 %v3555_v0  ;;  %v3117_v2 = vld [vmem:[#allocation7] ss:$12 sps:$4 sm:$0xff]   ;;  %319 = vmatprep.subr.bf16.mxu0 %v3115_v1  ;;  %v3118_v3 = vld [vmem:[#allocation7 + $0x1c] ss:$12 sps:$4 sm:$0xff]   ;;  %v3120_v4 = vld [vmem:[#allocation7 + $0x18] ss:$12 sps:$4 sm:$0xff]  }
  0x71   :  { %320 = vmatpush1.bf16.msra.mxu0 %v3117_v2  ;;  %v3121_v5 = vld [vmem:[#allocation7 + $0x34] ss:$12 sps:$4 sm:$0xff]   ;;  %v3123_v6 = vld [vmem:[#allocation7 + $0x30] ss:$12 sps:$4 sm:$0xff]   ;;  %v3124_v7 = vld [vmem:[#allocation7 + $0x4c] ss:$12 sps:$4 sm:$0xff]  }
  0x72   :  { %321 = vmatprep.subr.bf16.mxu0 %v3118_v3  ;;  %v3126_v8 = vld [vmem:[#allocation7 + $0x48] ss:$12 sps:$4 sm:$0xff]   ;;  %v3127_v9 = vld [vmem:[#allocation7 + $0x64] ss:$12 sps:$4 sm:$0xff]   ;;  %v3129_v10 = vld [vmem:[#allocation7 + $0x60] ss:$12 sps:$4 sm:$0xff]  }
  0x73   :  { %v3130_v11 = vld [vmem:[#allocation7 + $0x7c] ss:$12 sps:$4 sm:$0xff]   ;;  %v3132_v12 = vld [vmem:[#allocation7 + $0x78] ss:$12 sps:$4 sm:$0xff]   ;;  %v3133_v13 = vld [vmem:[#allocation7 + $0x94] ss:$12 sps:$4 sm:$0xff]  }
  0x74   :  { %v3135_v14 = vld [vmem:[#allocation7 + $0x90] ss:$12 sps:$4 sm:$0xff]   ;;  %v3136_v15 = vld [vmem:[#allocation7 + $0xac] ss:$12 sps:$4 sm:$0xff]   ;;  %v3138_v16 = vld [vmem:[#allocation7 + $0xa8] ss:$12 sps:$4 sm:$0xff]  }
  0x75   :  { %322 = vmatpush1.bf16.msra.mxu0 %v3120_v4  ;;  %v3745_v17 = vld [vmem:[#allocation2] sm:$0xff]  ;;  %v3751_v21 = vshrl.u32 %v176_v20, 7  ;;  %vm475_vm0 = vcmask 261120   ;;  %s3556_s29 = smov 32   ;;  %s3557_s19 = smov 96   ;;  %v3558_v41 = vmov 0.0  }
  0x76   :  { %323 = vmatprep.subr.bf16.mxu0 %v3121_v5  ;;  %v141_v19 = vpack.c.bf16 %v3747_v18, %v3745_v17  ;;  %v3759_v23 = vld [vmem:[%s4038_s3] sm:$0x7]  ;;  %v3139_v40 = vld [vmem:[#allocation7 + $0x8] ss:$12 sps:$4 sm:$0xff]   ;;  %2825 = vmatprep.subr.bf16.mxu1 %v3558_v41  ;;  %vm3559_vm1 = vmmov 0   ;;  %vm565_vm2 = vcmask 523264  }
  0x77   :  { %v3754_v22 = vsub.s32 0, %v3751_v21  ;;  %v3762_v24 = vsub.s32 1, %v3751_v21  ;;  %2841 = vmatprep.mubr.msk.bf16.mxu1 %vm3559_vm1, %v3558_v41  ;;  %2826 = vmatpush3.bf16.msra.mxu1 %v3139_v40  ;;  %v3140_v42 = vld [vmem:[#allocation7 + $0x20] ss:$12 sps:$4 sm:$0xff]   ;;  %v3141_v43 = vld [vmem:[#allocation7 + $0x38] ss:$12 sps:$4 sm:$0xff]  }
  0x78   :  { %2827 = vmatprep.subr.bf16.mxu1 %v3558_v41  ;;  %v3142_v44 = vld [vmem:[#allocation7 + $0x50] ss:$12 sps:$4 sm:$0xff]   ;;  %v3143_v45 = vld [vmem:[#allocation7 + $0x68] ss:$12 sps:$4 sm:$0xff]   ;;  %v3144_v46 = vld [vmem:[#allocation7 + $0x80] ss:$12 sps:$4 sm:$0xff]  }
  0x79   :  { %324 = vmatpush1.bf16.msra.mxu0 %v3123_v6  ;;  %v179_v25 = vrot.slane %v3759_v23, %v3754_v22  ;;  %v183_v27 = vrot.slane %v3759_v23, %v3762_v24  ;;  %v3145_v47 = vld [vmem:[#allocation7 + $0x98] ss:$12 sps:$4 sm:$0xff]   ;;  %v3146_v48 = vld [vmem:[#allocation7 + $0xb0] ss:$12 sps:$4 sm:$0xff]   ;;  %vm763_vm3 = vcmask 785408   ;;  %s3560_s0 = smov [#allocation13]  }
  0x7a   :  { %325 = vmatprep.subr.bf16.mxu0 %v3124_v7  ;;  %v137_v40 = vld [vmem:[#allocation5 + $0x20] sm:$0xff]  ;;  %s2534_s28 = sshll.u32 %s3560_s0, 4  ;;  %s2535_s28 = int_to_ptr.vmem [resolvable:$true] %s2534_s28 }
  0x7b   :  { %2828 = vmatpush3.bf16.msra.mxu1 %v3140_v42  ;;  %s3511_s22 = scalar_lea.vmem %s2535_s28, 256  ;;  %p3516_p7 = scmp.lt.s32.totalorder %s2535_s28, %s2535_s28 }
  0x7c   :  { %2829 = vmatprep.subr.bf16.mxu1 %v3558_v41  ;;  %p3512_p6 = scmp.ne.s32.totalorder %s2535_s28, %s3511_s22  ;;  %p3517_p8 = scmp.lt.s32.totalorder %s3511_s22, %s3511_s22 }
  0x7d   :  { %326 = vmatpush1.bf16.msra.mxu0 %v3126_v8 }
  0x7e   :  { %327 = vmatprep.subr.bf16.mxu0 %v3127_v9  ;;  %p3518_p9 = por %p3517_p8, %p3516_p7 }
  0x7f   :  { %2830 = vmatpush3.bf16.msra.mxu1 %v3141_v43 }
  0x80   :  { %2831 = vmatprep.subr.bf16.mxu1 %v3558_v41  ;;  %p3519_p10 = pnand %p3518_p9, %p3512_p6 }
  0x81   :  { %328 = vmatpush1.bf16.msra.mxu0 %v3129_v10 }
  0x82   :  { %329 = vmatprep.subr.bf16.mxu0 %v3130_v11 }
  0x83   :  { %2832 = vmatpush3.bf16.msra.mxu1 %v3142_v44 }
  0x84   :  { %2833 = vmatprep.subr.bf16.mxu1 %v3558_v41 }
  0x85   :  { %330 = vmatpush1.bf16.msra.mxu0 %v3132_v12 }
  0x86   :  { %331 = vmatprep.subr.bf16.mxu0 %v3133_v13  ;;  %v186_v13 = vsub.s32 2, %v3751_v21 }
  0x87   :  { %2834 = vmatpush3.bf16.msra.mxu1 %v3143_v45  ;;  %v139_v45 = vld [vmem:[#allocation5 + $0x30] sm:$0xff] }
  0x88   :  { %2835 = vmatprep.subr.bf16.mxu1 %v3558_v41 }
  0x89   :  { %332 = vmatpush1.bf16.msra.mxu0 %v3135_v14  ;;  %v187_v14 = vrot.slane %v3759_v23, %v186_v13 }
  0x8a   :  { %333 = vmatprep.subr.bf16.mxu0 %v3136_v15 }
  0x8b   :  { %2836 = vmatpush3.bf16.msra.mxu1 %v3144_v46 }
  0x8c   :  { %2837 = vmatprep.subr.bf16.mxu1 %v3558_v41 }
  0x8d   :  { %334 = vmatpush1.bf16.msra.mxu0 %v3138_v16 }
  0x8f   :  { %2838 = vmatpush3.bf16.msra.mxu1 %v3145_v47  ;;  %v138_v47 = vld [vmem:[#allocation5 + $0x28] sm:$0xff] }
  0x90   :  { %352 = vmatmul.mubr.bf16.vlgmr.msra.gmra.mrb[0].mxu0 %v141_v19  ;;  %2839 = vmatprep.subr.bf16.mxu1 %v3558_v41 }
  0x93   :  { %2840 = vmatpush3.bf16.msra.mxu1 %v3146_v48 }
  0x96   :  { %2842 = vmatmul.mubr.bf16.vlgmr.msra.gmra.mrb[0].mxu1 %v141_v19 }
 0x163   :  { %v353_v26 = vpop.f32.mrb[0].mxu0 }
 0x164   :  { %v355_v28 = vpop.f32.mrb[1].mxu0  ;;  %v354_v30 = vadd.f32 %v353_v26, %v179_v25 }
 0x165   :  { %v357_v29 = vpop.f32.mrb[2].mxu0  ;;  %v356_v33 = vadd.f32 %v355_v28, %v183_v27  ;;  %v133_v28 = vld [vmem:[#allocation5] sm:$0xff] }
 0x166   :  { %v358_v31 = vadd.f32 %v357_v29, %v179_v25  ;;  %v359_v32 = vpop.f32.mrb[3].mxu0 }
 0x167   :  { %v360_v34 = vadd.f32 %v359_v32, %v183_v27  ;;  %v134_v32 = vld [vmem:[#allocation5 + $0x8] sm:$0xff] }
 0x168   :  { %v423_v35 = vpack.c.bf16 %v358_v31, %v354_v30  ;;  %v3010_v36 = vpack.i.bf16 %v358_v31, %v354_v30  ;;  %v135_v30 = vld [vmem:[#allocation5 + $0x10] sm:$0xff] }
 0x169   :  { %v3005_v37 = vpack.i.bf16 %v360_v34, %v356_v33  ;;  %v447_v38 = vpack.c.bf16 %v360_v34, %v356_v33  ;;  %v396_v15 = vpop.f32.mrb[0].mxu1 }
 0x16a   :  { %2853 = vmatprep.mubr.msk.bf16.mxu0 %vm475_vm0, %v423_v35  ;;  %v2843_v16 = vpop.f32.mrb[1].mxu1  ;;  %v397_v20 = vadd.f32 %v396_v15, %v187_v14 }
 0x16b   :  { %3006 = vrot.lane.b32.xlu1 %v3005_v37, %s3556_s29  ;;  %2996 = vrot.lane.b32.xlu0 %v3005_v37, %s3557_s19  ;;  %v489_v39 = vsel %vm475_vm0, %v447_v38, 0  ;;  %v399_v19 = vpop.f32.mrb[2].mxu1 }
 0x16c   :  { %2969 = vmatprep.subr.msk.bf16.mxu0 %vm475_vm0, %v447_v38  ;;  %v400_v25 = vadd.f32 %v399_v19, %v187_v14  ;;  %v2844_v26 = vpop.f32.mrb[3].mxu1  ;;  %v136_v38 = vld [vmem:[#allocation5 + $0x18] sm:$0xff] }
 0x16d   :  { %2846 = vmatpush3.bf16.xpose.msra.mxu0 %v489_v39 }
 0x16e   :  { %v471_v27 = vpack.c.bf16 %v400_v25, %v397_v20 }
 0x16f   :  { %3001 = vrot.lane.b32.xlu0 %v3005_v37, %s4055_s8  ;;  %3011 = vrot.lane.b32.xlu1 %v3010_v36, %s3557_s19 }
 0x170   :  { %2861 = vmatprep.subr.bf16.mxu1 %v471_v27 }
 0x171   :  { %2862 = vmatpush3.bf16.msra.mxu1 %v471_v27 }
 0x173   :  { %3016 = vrot.lane.b32.xlu0 %v3010_v36, %s4055_s8  ;;  %3021 = vrot.lane.b32.xlu1 %v3010_v36, %s3556_s29 }
 0x1dd   :  { %v2997_v49 = vpop.permute.xlu0 %2996  ;;  %v3007_v57 = vpop.permute.xlu1 %3006 }
 0x1de   :  { %v2999_v50 = vunpack.i.h.bf16 %v2997_v49  ;;  %v2998_v51 = vunpack.i.l.bf16 %v2997_v49  ;;  %v3009_v59 = vunpack.i.h.bf16 %v3007_v57  ;;  %v3008_v60 = vunpack.i.l.bf16 %v3007_v57 }
 0x1e0   :  { %v448_v52 = vpack.c.bf16 %v2999_v50, %v2998_v51  ;;  %v450_v61 = vpack.c.bf16 %v3009_v59, %v3008_v60  ;;  %v3809_v60 = vpack.i.bf16 %v400_v25, %v397_v20 }
 0x1e1   :  { %v3002_v53 = vpop.permute.xlu0 %3001  ;;  %v3012_v63 = vpop.permute.xlu1 %3011 }
 0x1e2   :  { %v3004_v54 = vunpack.i.h.bf16 %v3002_v53  ;;  %v3003_v55 = vunpack.i.l.bf16 %v3002_v53  ;;  %2970 = vmatprep.subr.msk.bf16.mxu0 %vm475_vm0, %v448_v52  ;;  %v492_v56 = vsel %vm475_vm0, %v448_v52, 0  ;;  %v498_v2 = vsel %vm475_vm0, %v450_v61, 0 }
 0x1e3   :  { %2848 = vmatpush3.bf16.xpose.msra.mxu0 %v492_v56  ;;  %v3014_v3 = vunpack.i.h.bf16 %v3012_v63  ;;  %v3013_v4 = vunpack.i.l.bf16 %v3012_v63 }
 0x1e4   :  { %v449_v58 = vpack.c.bf16 %v3004_v54, %v3003_v55  ;;  %v140_v55 = vld [vmem:[#allocation5 + $0x38] sm:$0xff] }
 0x1e5   :  { %v3017_v1 = vpop.permute.xlu0 %3016  ;;  %v424_v7 = vpack.c.bf16 %v3014_v3, %v3013_v4  ;;  %v3022_v9 = vpop.permute.xlu1 %3021 }
 0x1e6   :  { %2971 = vmatprep.subr.msk.bf16.mxu0 %vm475_vm0, %v449_v58  ;;  %v495_v62 = vsel %vm475_vm0, %v449_v58, 0  ;;  %v3019_v5 = vunpack.i.h.bf16 %v3017_v1  ;;  %v3018_v6 = vunpack.i.l.bf16 %v3017_v1  ;;  %v3024_v10 = vunpack.i.h.bf16 %v3022_v9 }
 0x1e7   :  { %v3023_v11 = vunpack.i.l.bf16 %v3022_v9 }
 0x1e8   :  { %v425_v8 = vpack.c.bf16 %v3019_v5, %v3018_v6 }
 0x1e9   :  { %v426_v12 = vpack.c.bf16 %v3024_v10, %v3023_v11 }
 0x1eb   :  { %2850 = vmatpush3.bf16.xpose.msra.mxu0 %v495_v62 }
 0x1ec   :  { %2972 = vmatprep.subr.msk.bf16.mxu0 %vm475_vm0, %v450_v61 }
 0x1f3   :  { %2852 = vmatpush3.bf16.xpose.msra.mxu0 %v498_v2 }
 0x1fa   :  { %2854 = vmatmul.mubr.msk.bf16.vlgmr.msra.gmra.mrb[4].mxu0 %vm475_vm0, %v424_v7 }
 0x1fb   :  { %2857 = vmatprep.mubr.msk.bf16.mxu0 %vm475_vm0, %v425_v8 }
 0x202   :  { %2858 = vmatmul.mubr.msk.bf16.gmra.mrb[8].mxu0 %vm475_vm0, %v426_v12 }
 0x203   :  { %1063 = vmatprep.mubr.bf16.mxu0 %v3555_v0 }
 0x2cd   :  { %v2855_v29 = vpop.f32.mrb[4].mxu0 }
 0x2ce   :  { %v534_v31 = vpop.f32.mrb[5].mxu0  ;;  %v543_v36 = vadd.f32 %v2855_v29, %v135_v30 }
 0x2cf   :  { %v535_v33 = vadd.f32 %v534_v31, %v133_v28  ;;  %v2856_v34 = vpop.f32.mrb[6].mxu0 }
 0x2d0   :  { %v537_v35 = vpop.f32.mrb[7].mxu0  ;;  %v546_v42 = vadd.f32 %v2856_v34, %v136_v38  ;;  %v572_v44 = vsel %vm565_vm2, %v543_v36, -inf }
 0x2d1   :  { %v538_v23 = vadd.f32 %v537_v35, %v134_v32  ;;  %v566_v37 = vsel %vm565_vm2, %v535_v33, -inf }
 0x2d2   :  { %567 = vmax.xlane.f32.xlu0 %v566_v37  ;;  %v575_v54 = vsel %vm565_vm2, %v546_v42, -inf }
 0x2d3   :  { %v569_v39 = vsel %vm565_vm2, %v538_v23, -inf }
 0x2d4   :  { %570 = vmax.xlane.f32.xlu1 %v569_v39 }
 0x2d5   :  { %v2859_v43 = vpop.f32.mrb[8].mxu0 }
 0x2d6   :  { %v550_v46 = vpop.f32.mrb[9].mxu0  ;;  %573 = vmax.xlane.f32.xlu0 %v572_v44  ;;  %v559_v51 = vadd.f32 %v2859_v43, %v139_v45 }
 0x2d7   :  { %v551_v48 = vadd.f32 %v550_v46, %v137_v40  ;;  %v2860_v49 = vpop.f32.mrb[10].mxu0 }
 0x2d8   :  { %v553_v50 = vpop.f32.mrb[11].mxu0  ;;  %v562_v56 = vadd.f32 %v2860_v49, %v140_v55  ;;  %v584_v57 = vsel %vm565_vm2, %v559_v51, -inf }
 0x2d9   :  { %v554_v52 = vadd.f32 %v553_v50, %v138_v47  ;;  %v578_v53 = vsel %vm565_vm2, %v551_v48, -inf }
 0x2da   :  { %579 = vmax.xlane.f32.xlu1 %v578_v53  ;;  %576 = vmax.xlane.f32.xlu0 %v575_v54  ;;  %v587_v59 = vsel %vm565_vm2, %v562_v56, -inf }
 0x2db   :  { %v581_v58 = vsel %vm565_vm2, %v554_v52, -inf }
 0x2de   :  { %585 = vmax.xlane.f32.xlu1 %v584_v57  ;;  %582 = vmax.xlane.f32.xlu0 %v581_v58 }
 0x2e2   :  { %588 = vmax.xlane.f32.xlu0 %v587_v59 }
 0x2ef   :  { %3026 = vrot.lane.b32.xlu1 %v3809_v60, %s3557_s19 }
 0x35f   :  { %v568_v61 = vpop.xlane.xlu0 %567 }
 0x360   :  { %v590_v62 = vsub.f32 %v535_v33, %v568_v61 }
 0x361   :  { %v571_v63 = vpop.xlane.xlu1 %570 }
 0x362   :  { %v598_v3 = vmul.f32 1.442695, %v590_v62  ;;  %v591_v5 = vsub.f32 %v538_v23, %v571_v63 }
 0x363   :  { %v574_v1 = vpop.xlane.xlu0 %573 }
 0x364   :  { %v592_v2 = vsub.f32 %v543_v36, %v574_v1  ;;  %v600_v11 = vmul.f32 1.442695, %v591_v5 }
 0x366   :  { %v602_v4 = vmul.f32 1.442695, %v592_v2 }
 0x367   :  { %v580_v6 = vpop.xlane.xlu1 %579  ;;  %v577_v7 = vpop.xlane.xlu0 %576 }
 0x368   :  { %3275 = vpow2.f32 %v602_v4  ;;  %v593_v8 = vsub.f32 %v546_v42, %v577_v7  ;;  %v594_v9 = vsub.f32 %v551_v48, %v580_v6 }
 0x369   :  { %3277 = vpow2.f32 %v598_v3 }
 0x36a   :  { %v604_v10 = vmul.f32 1.442695, %v593_v8  ;;  %v606_v16 = vmul.f32 1.442695, %v594_v9 }
 0x36b   :  { %v586_v12 = vpop.xlane.xlu1 %585  ;;  %v583_v14 = vpop.xlane.xlu0 %582 }
 0x36c   :  { %v596_v15 = vsub.f32 %v559_v51, %v586_v12  ;;  %3279 = vpow2.f32 %v604_v10  ;;  %v595_v20 = vsub.f32 %v554_v52, %v583_v14 }
 0x36d   :  { %3281 = vpow2.f32 %v600_v11 }
 0x36e   :  { %v610_v19 = vmul.f32 1.442695, %v596_v15  ;;  %v608_v33 = vmul.f32 1.442695, %v595_v20 }
 0x36f   :  { %v589_v25 = vpop.xlane.xlu0 %588  ;;  %v3027_v26 = vpop.permute.xlu1 %3026 }
 0x370   :  { %3283 = vpow2.f32 %v610_v19  ;;  %v597_v27 = vsub.f32 %v562_v56, %v589_v25  ;;  %v3029_v28 = vunpack.i.h.bf16 %v3027_v26  ;;  %v3028_v29 = vunpack.i.l.bf16 %v3027_v26 }
 0x371   :  { %3285 = vpow2.f32 %v606_v16 }
 0x372   :  { %v3813_v30 = vpop.eup %3275  ;;  %v612_v31 = vmul.f32 1.442695, %v597_v27  ;;  %v472_v32 = vpack.c.bf16 %v3029_v28, %v3028_v29  ;;  %v3147_v29 = vld [vmem:[#allocation8] sm:$0xff]  }
 0x373   :  { %v620_v34 = vsel %vm565_vm2, %v3813_v30, 0.0  ;;  %v3278_v35 = vpop.eup %3277 }
 0x374   :  { %3287 = vpow2.f32 %v612_v31  ;;  %621 = vadd.xlane.f32.xlu1 %v620_v34  ;;  %2863 = vmatprep.subr.bf16.mxu1 %v472_v32  ;;  %v614_v23 = vsel %vm565_vm2, %v3278_v35, 0.0  ;;  %v3149_v31 = vld [vmem:[#allocation8 + $0x10] sm:$0xff]   ;;  %v3152_v34 = vld [vmem:[#allocation8 + $0x28] sm:$0xff]  }
 0x375   :  { %2864 = vmatpush3.bf16.msra.mxu1 %v472_v32  ;;  %3289 = vpow2.f32 %v608_v33  ;;  %v3150_v32 = vld [vmem:[#allocation8 + $0x18] sm:$0xff]   ;;  %v3151_v33 = vld [vmem:[#allocation8 + $0x20] sm:$0xff]  }
 0x376   :  { %v3280_v36 = vpop.eup %3279 }
 0x377   :  { %v623_v37 = vsel %vm565_vm2, %v3280_v36, 0.0  ;;  %v3282_v38 = vpop.eup %3281 }
 0x378   :  { %615 = vadd.xlane.f32.xlu1 %v614_v23  ;;  %624 = vadd.xlane.f32.xlu0 %v623_v37  ;;  %v617_v43 = vsel %vm565_vm2, %v3282_v38, 0.0 }
 0x37a   :  { %v3819_v39 = vpop.eup %3283 }
 0x37b   :  { %v632_v40 = vsel %vm565_vm2, %v3819_v39, 0.0  ;;  %v3286_v42 = vpop.eup %3285 }
 0x37c   :  { %633 = vadd.xlane.f32.xlu1 %v632_v40  ;;  %618 = vadd.xlane.f32.xlu0 %v617_v43  ;;  %v626_v45 = vsel %vm565_vm2, %v3286_v42, 0.0 }
 0x37e   :  { %v3288_v44 = vpop.eup %3287 }
 0x37f   :  { %v635_v46 = vsel %vm565_vm2, %v3288_v44, 0.0  ;;  %v3290_v47 = vpop.eup %3289 }
 0x380   :  { %627 = vadd.xlane.f32.xlu1 %v626_v45  ;;  %636 = vadd.xlane.f32.xlu0 %v635_v46  ;;  %v629_v48 = vsel %vm565_vm2, %v3290_v47, 0.0 }
 0x384   :  { %630 = vadd.xlane.f32.xlu0 %v629_v48 }
 0x391   :  { %3036 = vrot.lane.b32.xlu1 %v3809_v60, %s3556_s29 }
 0x39a   :  { %3031 = vrot.lane.b32.xlu0 %v3809_v60, %s4055_s8 }
 0x401   :  { %v622_v49 = vpop.xlane.xlu1 %621 }
 0x405   :  { %v616_v50 = vpop.xlane.xlu1 %615  ;;  %v625_v51 = vpop.xlane.xlu0 %624 }
 0x406   :  { %3291 = vrcp.f32 %v616_v50 }
 0x409   :  { %v634_v52 = vpop.xlane.xlu1 %633  ;;  %v619_v53 = vpop.xlane.xlu0 %618 }
 0x40a   :  { %3293 = vrcp.f32 %v619_v53 }
 0x40b   :  { %3295 = vrcp.f32 %v625_v51 }
 0x40c   :  { %3297 = vrcp.f32 %v622_v49 }
 0x40d   :  { %v628_v54 = vpop.xlane.xlu1 %627  ;;  %v637_v55 = vpop.xlane.xlu0 %636 }
 0x40e   :  { %3299 = vrcp.f32 %v628_v54 }
 0x410   :  { %v3292_v57 = vpop.eup %3291 }
 0x411   :  { %v631_v56 = vpop.xlane.xlu0 %630  ;;  %v3037_v58 = vpop.permute.xlu1 %3036  ;;  %v646_v62 = vmul.f32 %v3292_v57, %v3278_v35  ;;  %v3153_v35 = vld [vmem:[#allocation8 + $0x30] sm:$0xff]  }
 0x412   :  { %3301 = vrcp.f32 %v631_v56  ;;  %v3039_v63 = vunpack.i.h.bf16 %v3037_v58  ;;  %v3038_v1 = vunpack.i.l.bf16 %v3037_v58 }
 0x413   :  { %3303 = vrcp.f32 %v637_v55 }
 0x414   :  { %v3294_v59 = vpop.eup %3293  ;;  %3305 = vrcp.f32 %v634_v52  ;;  %v474_v8 = vpack.c.bf16 %v3039_v63, %v3038_v1  ;;  %v2581_v1 = vld [vmem:[%s4040_s5] ss:$0 sm:$0xff] }
 0x415   :  { %v3032_v61 = vpop.permute.xlu0 %3031  ;;  %v647_v60 = vmul.f32 %v3294_v59, %v3282_v38  ;;  %v3296_v6 = vpop.eup %3295  ;;  %v3154_v38 = vld [vmem:[#allocation8 + $0x38] sm:$0xff]  }
 0x416   :  { %v3034_v2 = vunpack.i.h.bf16 %v3032_v61  ;;  %v3033_v3 = vunpack.i.l.bf16 %v3032_v61  ;;  %v3298_v7 = vpop.eup %3297  ;;  %v649_v11 = vmul.f32 %v3296_v6, %v3280_v36 }
 0x417   :  { %v654_v4 = vpack.c.bf16 %v647_v60, %v646_v62  ;;  %v648_v14 = vmul.f32 %v3298_v7, %v3813_v30  ;;  %v3148_v30 = vld [vmem:[#allocation8 + $0x8] sm:$0xff]  }
 0x418   :  { %v473_v5 = vpack.c.bf16 %v3034_v2, %v3033_v3  ;;  %v3300_v9 = vpop.eup %3299 }
 0x419   :  { %2869 = vmatprep.mubr.msk.bf16.mxu1 %vm565_vm2, %v654_v4  ;;  %v650_v15 = vmul.f32 %v3300_v9, %v3286_v42  ;;  %v655_v16 = vpack.c.bf16 %v649_v11, %v648_v14  ;;  %v3157_v11 = vld [vmem:[#allocation10 + $0x4] ss:$8 sps:$4 sm:$0xff]   ;;  %v3158_v14 = vld [vmem:[#allocation10 + $0x10] ss:$8 sps:$4 sm:$0xff]  }
 0x41a   :  { %2865 = vmatprep.subr.bf16.mxu1 %v473_v5  ;;  %1031 = vmatprep.subr.bf16.mxu0 %v3157_v11 }
 0x41b   :  { %2866 = vmatpush3.bf16.msra.mxu1 %v473_v5 }
 0x41c   :  { %v3302_v10 = vpop.eup %3301  ;;  %2867 = vmatprep.subr.bf16.mxu1 %v474_v8 }
 0x41d   :  { %v651_v12 = vmul.f32 %v3302_v10, %v3290_v47  ;;  %v3304_v19 = vpop.eup %3303  ;;  %v3155_v10 = vld [vmem:[#allocation10] ss:$8 sps:$4 sm:$0xff]  }
 0x41e   :  { %v3306_v25 = vpop.eup %3305  ;;  %v653_v26 = vmul.f32 %v3304_v19, %v3288_v44  ;;  %1032 = vmatpush1.bf16.msra.mxu0 %v3155_v10 }
 0x41f   :  { %2868 = vmatpush3.bf16.msra.mxu1 %v474_v8  ;;  %v656_v20 = vpack.c.bf16 %v651_v12, %v650_v15  ;;  %v652_v27 = vmul.f32 %v3306_v25, %v3819_v39  ;;  %v3160_v12 = vld [vmem:[#allocation10 + $0x14] ss:$8 sps:$4 sm:$0xff]  }
 0x420   :  { %2877 = vmatprep.subr.bf16.mxu1 %v3558_v41  ;;  %1033 = vmatprep.subr.bf16.mxu0 %v3160_v12 }
 0x421   :  { %v657_v28 = vpack.c.bf16 %v653_v26, %v652_v27 }
 0x422   :  { %2870 = vmatmul.mubr.msk.bf16.vlgmr.msra.gmra.mrb[4].mxu1 %vm565_vm2, %v655_v16  ;;  %1034 = vmatpush1.bf16.msra.mxu0 %v3158_v14 }
 0x423   :  { %2873 = vmatprep.mubr.msk.bf16.mxu1 %vm565_vm2, %v656_v20  ;;  %2878 = vmatpush3.bf16.msra.mxu1 %v3147_v29  ;;  %v3166_v29 = vld [vmem:[#allocation10 + $0x34] ss:$8 sps:$4 sm:$0xff]  }
 0x424   :  { %2879 = vmatprep.subr.bf16.mxu1 %v3558_v41 }
 0x427   :  { %2880 = vmatpush3.bf16.msra.mxu1 %v3148_v30  ;;  %v3164_v30 = vld [vmem:[#allocation10 + $0x30] ss:$8 sps:$4 sm:$0xff]  }
 0x428   :  { %2881 = vmatprep.subr.bf16.mxu1 %v3558_v41 }
 0x42a   :  { %2874 = vmatmul.mubr.msk.bf16.gmra.mrb[8].mxu1 %vm565_vm2, %v657_v28  ;;  %v3161_v28 = vld [vmem:[#allocation10 + $0x20] ss:$8 sps:$4 sm:$0xff]  }
 0x42b   :  { %2893 = vmatprep.mubr.msk.bf16.mxu1 %vm3559_vm1, %v3558_v41  ;;  %2882 = vmatpush3.bf16.msra.mxu1 %v3149_v31  ;;  %v3169_v31 = vld [vmem:[#allocation10 + $0x44] ss:$8 sps:$4 sm:$0xff]  }
 0x42c   :  { %2883 = vmatprep.subr.bf16.mxu1 %v3558_v41 }
 0x42f   :  { %2884 = vmatpush3.bf16.msra.mxu1 %v3150_v32  ;;  %v3167_v32 = vld [vmem:[#allocation10 + $0x40] ss:$8 sps:$4 sm:$0xff]  }
 0x430   :  { %2885 = vmatprep.subr.bf16.mxu1 %v3558_v41 }
 0x433   :  { %2886 = vmatpush3.bf16.msra.mxu1 %v3151_v33  ;;  %v3172_v33 = vld [vmem:[#allocation10 + $0x54] ss:$8 sps:$4 sm:$0xff]  }
 0x434   :  { %2887 = vmatprep.subr.bf16.mxu1 %v3558_v41 }
 0x437   :  { %2888 = vmatpush3.bf16.msra.mxu1 %v3152_v34  ;;  %v3170_v34 = vld [vmem:[#allocation10 + $0x50] ss:$8 sps:$4 sm:$0xff]  }
 0x438   :  { %2889 = vmatprep.subr.bf16.mxu1 %v3558_v41 }
 0x43b   :  { %2890 = vmatpush3.bf16.msra.mxu1 %v3153_v35  ;;  %v3175_v35 = vld [vmem:[#allocation10 + $0x64] ss:$8 sps:$4 sm:$0xff]  }
 0x43c   :  { %2891 = vmatprep.subr.bf16.mxu1 %v3558_v41 }
 0x43f   :  { %2892 = vmatpush3.bf16.msra.mxu1 %v3154_v38 }
 0x4f5   :  { %v2871_v36 = vpop.f32.mrb[4].mxu1 }
 0x4f6   :  { %v704_v23 = vpop.f32.mrb[5].mxu1 }
 0x4f7   :  { %v2872_v37 = vpop.f32.mrb[6].mxu1 }
 0x4f8   :  { %v3040_v39 = vpack.i.bf16 %v2872_v37, %v2871_v36  ;;  %v707_v40 = vpop.f32.mrb[7].mxu1  ;;  %v3173_v36 = vld [vmem:[#allocation10 + $0x60] ss:$8 sps:$4 sm:$0xff]   ;;  %v3178_v37 = vld [vmem:[#allocation10 + $0x74] ss:$8 sps:$4 sm:$0xff]  }
 0x4fa   :  { %3041 = vrot.lane.b32.xlu1 %v3040_v39, %s3556_s29 }
 0x4fd   :  { %v2875_v42 = vpop.f32.mrb[8].mxu1 }
 0x4fe   :  { %v720_v43 = vpop.f32.mrb[9].mxu1 }
 0x4ff   :  { %v2876_v44 = vpop.f32.mrb[10].mxu1 }
 0x500   :  { %v3050_v45 = vpack.i.bf16 %v2876_v44, %v2875_v42  ;;  %v723_v46 = vpop.f32.mrb[11].mxu1 }
 0x501   :  { %v3045_v47 = vpack.i.bf16 %v723_v46, %v720_v43 }
 0x502   :  { %3051 = vrot.lane.b32.xlu1 %v3050_v45, %s3557_s19 }
 0x503   :  { %3046 = vrot.lane.b32.xlu0 %v3045_v47, %s4055_s8  ;;  %v2590_v47 = vld [vmem:[%s4041_s6] ss:$0 sm:$0xff] }
 0x56c   :  { %v3042_v48 = vpop.permute.xlu1 %3041 }
 0x56d   :  { %v3044_v49 = vunpack.i.h.bf16 %v3042_v48  ;;  %v3043_v50 = vunpack.i.l.bf16 %v3042_v48 }
 0x56f   :  { %v759_v55 = vsel %vm475_vm0, %v704_v23, %v3043_v50  ;;  %v760_v56 = vsel %vm475_vm0, %v707_v40, %v3044_v49  ;;  %v3176_v23 = vld [vmem:[#allocation10 + $0x70] ss:$8 sps:$4 sm:$0xff]  }
 0x574   :  { %v3052_v51 = vpop.permute.xlu1 %3051 }
 0x575   :  { %v3047_v52 = vpop.permute.xlu0 %3046  ;;  %v3054_v57 = vunpack.i.h.bf16 %v3052_v51  ;;  %v3053_v58 = vunpack.i.l.bf16 %v3052_v51  ;;  %v2591_v51 = vld [vmem:[%s4042_s7] ss:$0 sm:$0xff] }
 0x576   :  { %v3049_v53 = vunpack.i.h.bf16 %v3047_v52  ;;  %v3048_v54 = vunpack.i.l.bf16 %v3047_v52 }
 0x578   :  { %v762_v59 = vsel %vm565_vm2, %v760_v56, %v3049_v53  ;;  %v761_v61 = vsel %vm565_vm2, %v759_v55, %v3048_v54  ;;  %v3179_v56 = vld [vmem:[#allocation11 + $0x40] sm:$0xff]  }
 0x579   :  { %v765_v62 = vsel %vm763_vm3, %v762_v59, %v3054_v57  ;;  %v764_v60 = vsel %vm763_vm3, %v761_v61, %v3053_v58  ;;  %v3180_v57 = vld [vmem:[#allocation11] sm:$0xff]   ;;  %2747 = vmatprep.subr.bf16.mxu1 %v3179_v56  ;;  %v3181_v58 = vld [vmem:[#allocation11 + $0x48] sm:$0xff]   ;;  %v3183_v61 = vld [vmem:[#allocation11 + $0x50] sm:$0xff]  }
 0x57a   :  { %v766_v63 = vpack.c.bf16 %v765_v62, %v764_v60  ;;  %v3182_v59 = vld [vmem:[#allocation11 + $0x8] sm:$0xff]   ;;  %v3184_v62 = vld [vmem:[#allocation11 + $0x10] sm:$0xff]   ;;  %v3185_v60 = vld [vmem:[#allocation11 + $0x58] sm:$0xff]  }
 0x57c   :  { %2894 = vmatmul.mubr.bf16.vlgmr.msra.gmra.mrb[12].mxu1 %v766_v63  ;;  %v3186_v63 = vld [vmem:[#allocation11 + $0x18] sm:$0xff]  }
 0x57d   :  { %2748 = vmatpush3.bf16.msra.mxu1 %v3180_v57 }
 0x57e   :  { %2749 = vmatprep.subr.bf16.mxu1 %v3181_v58 }
 0x581   :  { %2750 = vmatpush3.bf16.msra.mxu1 %v3182_v59 }
 0x582   :  { %2751 = vmatprep.subr.bf16.mxu1 %v3183_v61 }
 0x585   :  { %2752 = vmatpush3.bf16.msra.mxu1 %v3184_v62 }
 0x586   :  { %2753 = vmatprep.subr.bf16.mxu1 %v3185_v60 }
 0x589   :  { %2754 = vmatpush3.bf16.msra.mxu1 %v3186_v63 }
 0x64f   :  { %v872_v2 = vpop.f32.mrb[12].mxu1 }
 0x650   :  { %v873_v3 = vadd.f32 %v2581_v1, %v872_v2  ;;  %v2895_v4 = vpop.f32.mrb[13].mxu1  ;;  %v3188_v2 = vld [vmem:[#allocation11 + $0x20] sm:$0xff]  }
 0x651   :  { %v875_v5 = vpop.f32.mrb[14].mxu1  ;;  %v3190_v4 = vld [vmem:[#allocation11 + $0x28] sm:$0xff]  }
 0x652   :  { %v876_v6 = vadd.f32 %v2581_v1, %v875_v5  ;;  %v2896_v7 = vpop.f32.mrb[15].mxu1  ;;  %v879_v8 = vadd.f32 %v873_v3, %v3745_v17  ;;  %v3187_v1 = vld [vmem:[#allocation11 + $0x60] sm:$0xff]   ;;  %v3189_v3 = vld [vmem:[#allocation11 + $0x68] sm:$0xff]   ;;  %v3191_v5 = vld [vmem:[#allocation11 + $0x70] sm:$0xff]  }
 0x653   :  { %2755 = vmatprep.subr.bf16.mxu1 %v3187_v1  ;;  %v3193_v7 = vld [vmem:[#allocation11 + $0x78] sm:$0xff]  }
 0x654   :  { %883 = vadd.xlane.f32.xlu0 %v879_v8  ;;  %v880_v9 = vadd.f32 %v876_v6, %v3747_v18  ;;  %v3163_v18 = vld [vmem:[#allocation10 + $0x24] ss:$8 sps:$4 sm:$0xff]   ;;  %2756 = vmatpush3.bf16.msra.mxu1 %v3188_v2  ;;  %v3192_v6 = vld [vmem:[#allocation11 + $0x30] sm:$0xff]  }
 0x655   :  { %1035 = vmatprep.subr.bf16.mxu0 %v3163_v18  ;;  %2757 = vmatprep.subr.bf16.mxu1 %v3189_v3  ;;  %v2608_v3 = vld [vmem:[%s4046_s11] ss:$0 sm:$0xff] }
 0x656   :  { %885 = vadd.xlane.f32.xlu1 %v880_v9  ;;  %1036 = vmatpush1.bf16.msra.mxu0 %v3161_v28 }
 0x657   :  { %1037 = vmatprep.subr.bf16.mxu0 %v3166_v29 }
 0x658   :  { %2758 = vmatpush3.bf16.msra.mxu1 %v3190_v4 }
 0x659   :  { %2759 = vmatprep.subr.bf16.mxu1 %v3191_v5 }
 0x65a   :  { %1038 = vmatpush1.bf16.msra.mxu0 %v3164_v30 }
 0x65b   :  { %1039 = vmatprep.subr.bf16.mxu0 %v3169_v31 }
 0x65c   :  { %2760 = vmatpush3.bf16.msra.mxu1 %v3192_v6 }
 0x65d   :  { %2761 = vmatprep.subr.bf16.mxu1 %v3193_v7 }
 0x65e   :  { %1040 = vmatpush1.bf16.msra.mxu0 %v3167_v32 }
 0x65f   :  { %1041 = vmatprep.subr.bf16.mxu0 %v3172_v33 }
 0x662   :  { %1042 = vmatpush1.bf16.msra.mxu0 %v3170_v34 }
 0x663   :  { %1043 = vmatprep.subr.bf16.mxu0 %v3175_v35 }
 0x666   :  { %1044 = vmatpush1.bf16.msra.mxu0 %v3173_v36 }
 0x667   :  { %1045 = vmatprep.subr.bf16.mxu0 %v3178_v37 }
 0x66a   :  { %1046 = vmatpush1.bf16.msra.mxu0 %v3176_v23 }
 0x6e1   :  { %v884_v15 = vpop.xlane.xlu0 %883 }
 0x6e2   :  { %v888_v16 = vmul.f32 0.0078125, %v884_v15 }
 0x6e3   :  { %v886_v19 = vpop.xlane.xlu1 %885 }
 0x6e4   :  { %v890_v20 = vsub.f32 %v879_v8, %v888_v16  ;;  %v889_v25 = vmul.f32 0.0078125, %v886_v19  ;;  %v3194_v8 = vld [vmem:[#allocation11 + $0x38] sm:$0xff]  }
 0x6e5   :  { %2762 = vmatpush3.bf16.msra.mxu1 %v3194_v8 }
 0x6e6   :  { %v891_v26 = vsub.f32 %v880_v9, %v889_v25  ;;  %v892_v27 = vmul.f32 %v890_v20, %v890_v20  ;;  %2897 = vmatprep.subr.bf16.mxu1 %v3558_v41  ;;  %v939_v9 = vld [vmem:[%s4044_s9] sm:$0x3] }
 0x6e7   :  { %v944_v10 = vrot.slane %v939_v9, %v3754_v22  ;;  %v948_v11 = vrot.slane %v939_v9, %v3762_v24 }
 0x6e8   :  { %894 = vadd.xlane.f32.xlu0 %v892_v27  ;;  %v893_v17 = vmul.f32 %v891_v26, %v891_v26 }
 0x6ec   :  { %896 = vadd.xlane.f32.xlu0 %v893_v17 }
 0x775   :  { %v895_v38 = vpop.xlane.xlu0 %894 }
 0x776   :  { %v898_v39 = vmul.f32 0.0078125, %v895_v38 }
 0x778   :  { %v900_v40 = vadd.f32 1e-12, %v898_v39 }
 0x779   :  { %v897_v42 = vpop.xlane.xlu0 %896 }
 0x77a   :  { %3307 = vrsqrt.f32 %v900_v40  ;;  %v899_v43 = vmul.f32 0.0078125, %v897_v42 }
 0x77c   :  { %v901_v44 = vadd.f32 1e-12, %v899_v43 }
 0x77e   :  { %3309 = vrsqrt.f32 %v901_v44 }
 0x784   :  { %v3308_v45 = vpop.eup %3307 }
 0x785   :  { %v904_v46 = vmul.f32 %v3308_v45, %v890_v20 }
 0x787   :  { %v912_v49 = vmul.f32 %v2590_v47, %v904_v46 }
 0x788   :  { %v3310_v48 = vpop.eup %3309 }
 0x789   :  { %v905_v50 = vmul.f32 %v3310_v48, %v891_v26  ;;  %v3867_v53 = vadd.f32 %v2591_v51, %v912_v49 }
 0x78b   :  { %v913_v52 = vmul.f32 %v2590_v47, %v905_v50 }
 0x78d   :  { %v3869_v54 = vadd.f32 %v2591_v51, %v913_v52 }
 0x78f   :  { %v922_v55 = vpack.c.bf16 %v3869_v54, %v3867_v53 }
 0x791   :  { %1064 = vmatmul.mubr.bf16.vlgmr.msra.gmra.mrb[12].mxu0 %v922_v55 }
 0x792   :  { %1542 = vmatprep.mubr.bf16.mxu0 %v3555_v0 }
 0x864   :  { %v1065_v12 = vpop.f32.mrb[12].mxu0 }
 0x865   :  { %v1066_v14 = vadd.f32 %v1065_v12, %v944_v10  ;;  %v1067_v15 = vpop.f32.mrb[13].mxu0 }
 0x866   :  { %v1068_v16 = vadd.f32 %v1067_v15, %v948_v11  ;;  %v1069_v19 = vpop.f32.mrb[14].mxu0  ;;  %v3197_v15 = vld [vmem:[#allocation7 + $0xc4] ss:$12 sps:$4 sm:$0xff]  }
 0x867   :  { %v1074_v20 = vmul.f32 %v1066_v14, %v1066_v14  ;;  %v1070_v25 = vadd.f32 %v1069_v19, %v944_v10  ;;  %v1071_v26 = vpop.f32.mrb[15].mxu0  ;;  %v3201_v19 = vld [vmem:[#allocation7 + $0xdc] ss:$12 sps:$4 sm:$0xff]   ;;  %1510 = vmatprep.subr.bf16.mxu0 %v3197_v15 }
 0x868   :  { %v1075_v27 = vmul.f32 %v1068_v16, %v1068_v16  ;;  %v1072_v17 = vadd.f32 %v1071_v26, %v948_v11 }
 0x869   :  { %v1078_v18 = vmul.f32 %v1074_v20, %v1066_v14  ;;  %v1076_v28 = vmul.f32 %v1070_v25, %v1070_v25  ;;  %v3202_v20 = vld [vmem:[#allocation7 + $0xe0] ss:$12 sps:$4 sm:$0xff]  }
 0x86a   :  { %v1079_v29 = vmul.f32 %v1075_v27, %v1068_v16  ;;  %v1077_v30 = vmul.f32 %v1072_v17, %v1072_v17 }
 0x86b   :  { %v1082_v31 = vmul.f32 0.044715, %v1078_v18  ;;  %v1080_v32 = vmul.f32 %v1076_v28, %v1070_v25 }
 0x86c   :  { %v1083_v33 = vmul.f32 0.044715, %v1079_v29  ;;  %v1081_v34 = vmul.f32 %v1077_v30, %v1072_v17  ;;  %v3205_v30 = vld [vmem:[#allocation7 + $0xf4] ss:$12 sps:$4 sm:$0xff]  }
 0x86d   :  { %v1086_v35 = vadd.f32 %v1082_v31, %v1066_v14  ;;  %v1084_v36 = vmul.f32 0.044715, %v1080_v32  ;;  %v3203_v31 = vld [vmem:[#allocation7 + $0xf0] ss:$12 sps:$4 sm:$0xff]   ;;  %v3206_v32 = vld [vmem:[#allocation7 + $0xf8] ss:$12 sps:$4 sm:$0xff]  }
 0x86e   :  { %v1087_v23 = vadd.f32 %v1083_v33, %v1068_v16  ;;  %v1085_v37 = vmul.f32 0.044715, %v1081_v34  ;;  %v3209_v33 = vld [vmem:[#allocation7 + $0x10c] ss:$12 sps:$4 sm:$0xff]   ;;  %v3207_v34 = vld [vmem:[#allocation7 + $0x108] ss:$12 sps:$4 sm:$0xff]  }
 0x86f   :  { %v1090_v38 = vmul.f32 0.7978846, %v1086_v35  ;;  %v1088_v39 = vadd.f32 %v1084_v36, %v1070_v25  ;;  %v3210_v35 = vld [vmem:[#allocation7 + $0x110] ss:$12 sps:$4 sm:$0xff]  }
 0x870   :  { %v1091_v40 = vmul.f32 0.7978846, %v1087_v23  ;;  %v1089_v42 = vadd.f32 %v1085_v37, %v1072_v17  ;;  %v3213_v36 = vld [vmem:[#allocation7 + $0x124] ss:$12 sps:$4 sm:$0xff]   ;;  %v3211_v23 = vld [vmem:[#allocation7 + $0x120] ss:$12 sps:$4 sm:$0xff]  }
 0x871   :  { %3311 = vtanh.f32 %v1090_v38  ;;  %v1092_v43 = vmul.f32 0.7978846, %v1088_v39  ;;  %v3214_v37 = vld [vmem:[#allocation7 + $0x128] ss:$12 sps:$4 sm:$0xff]   ;;  %v3215_v39 = vld [vmem:[#allocation7 + $0x138] ss:$12 sps:$4 sm:$0xff]  }
 0x872   :  { %3313 = vtanh.f32 %v1091_v40  ;;  %v1093_v44 = vmul.f32 0.7978846, %v1089_v42  ;;  %v3217_v38 = vld [vmem:[#allocation7 + $0x13c] ss:$12 sps:$4 sm:$0xff]   ;;  %v3218_v40 = vld [vmem:[#allocation7 + $0x140] ss:$12 sps:$4 sm:$0xff]  }
 0x873   :  { %3315 = vtanh.f32 %v1092_v43  ;;  %v3221_v42 = vld [vmem:[#allocation7 + $0x154] ss:$12 sps:$4 sm:$0xff]   ;;  %v3219_v43 = vld [vmem:[#allocation7 + $0x150] ss:$12 sps:$4 sm:$0xff]  }
 0x874   :  { %3317 = vtanh.f32 %v1093_v44  ;;  %v3222_v44 = vld [vmem:[#allocation7 + $0x158] ss:$12 sps:$4 sm:$0xff]  }
 0x87b   :  { %v3312_v45 = vpop.eup %3311 }
 0x87c   :  { %v3314_v46 = vpop.eup %3313  ;;  %v1098_v47 = vadd.f32 1.0, %v3312_v45  ;;  %v3225_v45 = vld [vmem:[#allocation7 + $0x16c] ss:$12 sps:$4 sm:$0xff]  }
 0x87d   :  { %v3316_v48 = vpop.eup %3315  ;;  %v1099_v49 = vadd.f32 1.0, %v3314_v46  ;;  %v3223_v46 = vld [vmem:[#allocation7 + $0x168] ss:$12 sps:$4 sm:$0xff]  }
 0x87e   :  { %v3318_v50 = vpop.eup %3317  ;;  %v1102_v51 = vmul.f32 0.5, %v1098_v47  ;;  %v1100_v52 = vadd.f32 1.0, %v3316_v48  ;;  %v3226_v47 = vld [vmem:[#allocation7 + $0x170] ss:$12 sps:$4 sm:$0xff]  }
 0x87f   :  { %v1101_v55 = vadd.f32 1.0, %v3318_v50  ;;  %v1103_v56 = vmul.f32 0.5, %v1099_v49 }
 0x880   :  { %v1104_v57 = vmul.f32 0.5, %v1100_v52  ;;  %v1106_v59 = vmul.f32 %v1102_v51, %v1066_v14  ;;  %v3195_v14 = vld [vmem:[#allocation7 + $0xc0] ss:$12 sps:$4 sm:$0xff]  }
 0x881   :  { %v1105_v58 = vmul.f32 0.5, %v1101_v55  ;;  %v1107_v62 = vmul.f32 %v1103_v56, %v1068_v16  ;;  %v3198_v16 = vld [vmem:[#allocation7 + $0xc8] ss:$12 sps:$4 sm:$0xff]   ;;  %1511 = vmatpush1.bf16.msra.mxu0 %v3195_v14 }
 0x882   :  { %v1108_v61 = vmul.f32 %v1104_v57, %v1070_v25  ;;  %v3199_v25 = vld [vmem:[#allocation7 + $0xd8] ss:$12 sps:$4 sm:$0xff]   ;;  %1512 = vmatprep.subr.bf16.mxu0 %v3201_v19  ;;  %v2625_v57 = vld [vmem:[%s4047_s12] ss:$0 sm:$0xff] }
 0x883   :  { %v1109_v60 = vmul.f32 %v1105_v58, %v1072_v17 }
 0x884   :  { %v1110_v63 = vpack.c.bf16 %v1108_v61, %v1106_v59 }
 0x885   :  { %v1111_v1 = vpack.c.bf16 %v1109_v60, %v1107_v62  ;;  %1513 = vmatpush1.bf16.msra.mxu0 %v3199_v25  ;;  %v2626_v60 = vld [vmem:[%s4048_s13] ss:$0 sm:$0xff] }
 0x886   :  { %1514 = vmatprep.subr.bf16.mxu0 %v3205_v30 }
 0x887   :  { %1279 = vmatprep.mubr.bf16.mxu1 %v1111_v1 }
 0x888   :  { %1280 = vmatmul.mubr.bf16.vlgmr.msra.gmra.mrb[16].mxu1 %v1110_v63 }
 0x889   :  { %2913 = vmatprep.mubr.msk.bf16.mxu1 %vm3559_vm1, %v3558_v41  ;;  %2898 = vmatpush3.bf16.msra.mxu1 %v3198_v16 }
 0x88a   :  { %2899 = vmatprep.subr.bf16.mxu1 %v3558_v41  ;;  %1515 = vmatpush1.bf16.msra.mxu0 %v3203_v31 }
 0x88b   :  { %1516 = vmatprep.subr.bf16.mxu0 %v3209_v33 }
 0x88d   :  { %2900 = vmatpush3.bf16.msra.mxu1 %v3202_v20 }
 0x88e   :  { %2901 = vmatprep.subr.bf16.mxu1 %v3558_v41  ;;  %1517 = vmatpush1.bf16.msra.mxu0 %v3207_v34 }
 0x88f   :  { %1518 = vmatprep.subr.bf16.mxu0 %v3213_v36 }
 0x891   :  { %2902 = vmatpush3.bf16.msra.mxu1 %v3206_v32 }
 0x892   :  { %2903 = vmatprep.subr.bf16.mxu1 %v3558_v41  ;;  %1519 = vmatpush1.bf16.msra.mxu0 %v3211_v23 }
 0x893   :  { %1520 = vmatprep.subr.bf16.mxu0 %v3217_v38 }
 0x895   :  { %2904 = vmatpush3.bf16.msra.mxu1 %v3210_v35 }
 0x896   :  { %2905 = vmatprep.subr.bf16.mxu1 %v3558_v41  ;;  %1521 = vmatpush1.bf16.msra.mxu0 %v3215_v39 }
 0x897   :  { %1522 = vmatprep.subr.bf16.mxu0 %v3221_v42 }
 0x899   :  { %2906 = vmatpush3.bf16.msra.mxu1 %v3214_v37 }
 0x89a   :  { %2907 = vmatprep.subr.bf16.mxu1 %v3558_v41  ;;  %1523 = vmatpush1.bf16.msra.mxu0 %v3219_v43 }
 0x89b   :  { %1524 = vmatprep.subr.bf16.mxu0 %v3225_v45 }
 0x89d   :  { %2908 = vmatpush3.bf16.msra.mxu1 %v3218_v40 }
 0x89e   :  { %2909 = vmatprep.subr.bf16.mxu1 %v3558_v41  ;;  %1525 = vmatpush1.bf16.msra.mxu0 %v3223_v46 }
 0x8a1   :  { %2910 = vmatpush3.bf16.msra.mxu1 %v3222_v44 }
 0x8a2   :  { %2911 = vmatprep.subr.bf16.mxu1 %v3558_v41 }
 0x8a5   :  { %2912 = vmatpush3.bf16.msra.mxu1 %v3226_v47 }
 0x95b   :  { %v2763_v2 = vpop.f32.mrb[16].mxu1 }
 0x95c   :  { %v2764_v4 = vpop.f32.mrb[17].mxu1 }
 0x95d   :  { %v2765_v5 = vadd.f32 %v2764_v4, %v2763_v2  ;;  %v2766_v6 = vpop.f32.mrb[18].mxu1  ;;  %v2627_v4 = vld [vmem:[%s4038_s3 + $0x3] sm:$0x7] }
 0x95e   :  { %v2767_v7 = vpop.f32.mrb[19].mxu1 }
 0x95f   :  { %v1282_v8 = vadd.f32 %v2765_v5, %v2608_v3  ;;  %v2768_v9 = vadd.f32 %v2767_v7, %v2766_v6  ;;  %v1370_v5 = vrot.slane %v2627_v4, %v3754_v22  ;;  %v1378_v6 = vrot.slane %v2627_v4, %v186_v13 }
 0x961   :  { %v1285_v10 = vadd.f32 %v2768_v9, %v2608_v3  ;;  %v1288_v11 = vadd.f32 %v1282_v8, %v3867_v53  ;;  %v1374_v9 = vrot.slane %v2627_v4, %v3762_v24  ;;  %v3372_v4 = vld [vmem:[#allocation5 + $0x10] sm:$0xff] }
 0x963   :  { %1292 = vadd.xlane.f32.xlu1 %v1288_v11  ;;  %v1289_v12 = vadd.f32 %v1285_v10, %v3869_v54 }
 0x965   :  { %1294 = vadd.xlane.f32.xlu0 %v1289_v12 }
 0x9f0   :  { %v1293_v53 = vpop.xlane.xlu1 %1292 }
 0x9f1   :  { %v1296_v26 = vmul.f32 0.0078125, %v1293_v53 }
 0x9f2   :  { %v1295_v54 = vpop.xlane.xlu0 %1294 }
 0x9f3   :  { %v1298_v27 = vsub.f32 %v1288_v11, %v1296_v26  ;;  %v1297_v17 = vmul.f32 0.0078125, %v1295_v54 }
 0x9f5   :  { %v1299_v18 = vsub.f32 %v1289_v12, %v1297_v17  ;;  %v1300_v28 = vmul.f32 %v1298_v27, %v1298_v27 }
 0x9f7   :  { %1302 = vadd.xlane.f32.xlu1 %v1300_v28  ;;  %v1301_v29 = vmul.f32 %v1299_v18, %v1299_v18 }
 0x9f9   :  { %1304 = vadd.xlane.f32.xlu0 %v1301_v29 }
 0xa84   :  { %v1303_v48 = vpop.xlane.xlu1 %1302 }
 0xa85   :  { %v1306_v49 = vmul.f32 0.0078125, %v1303_v48 }
 0xa86   :  { %v1305_v50 = vpop.xlane.xlu0 %1304 }
 0xa87   :  { %v1308_v51 = vadd.f32 1e-12, %v1306_v49  ;;  %v1307_v52 = vmul.f32 0.0078125, %v1305_v50 }
 0xa89   :  { %3319 = vrsqrt.f32 %v1308_v51  ;;  %v1309_v55 = vadd.f32 1e-12, %v1307_v52 }
 0xa8b   :  { %3321 = vrsqrt.f32 %v1309_v55 }
 0xa93   :  { %v3320_v56 = vpop.eup %3319 }
 0xa94   :  { %v1312_v58 = vmul.f32 %v3320_v56, %v1298_v27 }
 0xa95   :  { %v3322_v59 = vpop.eup %3321 }
 0xa96   :  { %v1313_v61 = vmul.f32 %v3322_v59, %v1299_v18  ;;  %v1320_v62 = vmul.f32 %v2625_v57, %v1312_v58 }
 0xa98   :  { %v1321_v63 = vmul.f32 %v2625_v57, %v1313_v61  ;;  %v3900_v1 = vadd.f32 %v2626_v60, %v1320_v62  ;;  %v3371_v62 = vld [vmem:[#allocation5] sm:$0xff] }
 0xa9a   :  { %v3902_v2 = vadd.f32 %v2626_v60, %v1321_v63 }
 0xa9c   :  { %v1330_v3 = vpack.c.bf16 %v3902_v2, %v3900_v1 }
 0xa9e   :  { %1543 = vmatmul.mubr.bf16.vlgmr.msra.gmra.mrb[16].mxu0 %v1330_v3  ;;  %2914 = vmatmul.mubr.bf16.vlgmr.msra.gmra.mrb[20].mxu1 %v1330_v3 }
 0xb71   :  { %v1544_v7 = vpop.f32.mrb[16].mxu0  ;;  %v1587_v8 = vpop.f32.mrb[20].mxu1 }
 0xb72   :  { %v1546_v10 = vpop.f32.mrb[17].mxu0  ;;  %v2915_v11 = vpop.f32.mrb[21].mxu1  ;;  %v1545_v15 = vadd.f32 %v1544_v7, %v1370_v5  ;;  %v1588_v16 = vadd.f32 %v1587_v8, %v1378_v6 }
 0xb73   :  { %v1548_v12 = vpop.f32.mrb[18].mxu0  ;;  %v1590_v14 = vpop.f32.mrb[22].mxu1  ;;  %v1547_v26 = vadd.f32 %v1546_v10, %v1374_v9  ;;  %v3374_v10 = vld [vmem:[#allocation5 + $0x18] sm:$0xff] }
 0xb74   :  { %v1549_v19 = vadd.f32 %v1548_v12, %v1370_v5  ;;  %v1591_v20 = vadd.f32 %v1590_v14, %v1378_v6  ;;  %v1550_v25 = vpop.f32.mrb[19].mxu0  ;;  %v2916_v53 = vpop.f32.mrb[23].mxu1  ;;  %v3373_v6 = vld [vmem:[#allocation5 + $0x8] sm:$0xff] }
 0xb75   :  { %v1551_v54 = vadd.f32 %v1550_v25, %v1374_v9  ;;  %v3376_v53 = vld [vmem:[#allocation5 + $0x30] sm:$0xff] }
 0xb76   :  { %v1614_v27 = vpack.c.bf16 %v1549_v19, %v1545_v15  ;;  %v1662_v17 = vpack.c.bf16 %v1591_v20, %v1588_v16  ;;  %v3075_v21 = vpack.i.bf16 %v1549_v19, %v1545_v15  ;;  %v3914_v28 = vpack.i.bf16 %v1591_v20, %v1588_v16  ;;  %v3375_v16 = vld [vmem:[#allocation5 + $0x20] sm:$0xff] }
 0xb77   :  { %v3060_v13 = vpack.i.bf16 %v1551_v54, %v1547_v26  ;;  %v1638_v18 = vpack.c.bf16 %v1551_v54, %v1547_v26  ;;  %v3377_v54 = vld [vmem:[#allocation5 + $0x28] sm:$0xff] }
 0xb78   :  { %2925 = vmatprep.mubr.msk.bf16.mxu0 %vm475_vm0, %v1614_v27  ;;  %2933 = vmatprep.subr.bf16.mxu1 %v1662_v17 }
 0xb79   :  { %2934 = vmatpush3.bf16.msra.mxu1 %v1662_v17  ;;  %3061 = vrot.lane.b32.xlu0 %v3060_v13, %s4055_s8  ;;  %v1679_v29 = vsel %vm475_vm0, %v1638_v18, 0 }
 0xb7a   :  { %3056 = vrot.lane.b32.xlu1 %v3060_v13, %s3557_s19  ;;  %2973 = vmatprep.subr.msk.bf16.mxu0 %vm475_vm0, %v1638_v18 }
 0xb7b   :  { %2918 = vmatpush3.bf16.xpose.msra.mxu0 %v1679_v29 }
 0xb7d   :  { %3076 = vrot.lane.b32.xlu0 %v3075_v21, %s4055_s8 }
 0xb7e   :  { %3066 = vrot.lane.b32.xlu1 %v3060_v13, %s3556_s29  ;;  %v3378_v13 = vld [vmem:[#allocation5 + $0x38] sm:$0xff] }
 0xb82   :  { %3071 = vrot.lane.b32.xlu1 %v3075_v21, %s3557_s19 }
 0xb86   :  { %3081 = vrot.lane.b32.xlu1 %v3075_v21, %s3556_s29 }
 0xbeb   :  { %v3062_v30 = vpop.permute.xlu0 %3061 }
 0xbec   :  { %v3057_v31 = vpop.permute.xlu1 %3056  ;;  %v3064_v32 = vunpack.i.h.bf16 %v3062_v30  ;;  %v3063_v33 = vunpack.i.l.bf16 %v3062_v30 }
 0xbed   :  { %v3059_v34 = vunpack.i.h.bf16 %v3057_v31  ;;  %v3058_v35 = vunpack.i.l.bf16 %v3057_v31 }
 0xbee   :  { %v1640_v23 = vpack.c.bf16 %v3064_v32, %v3063_v33 }
 0xbef   :  { %v1639_v36 = vpack.c.bf16 %v3059_v34, %v3058_v35  ;;  %v3077_v45 = vpop.permute.xlu0 %3076 }
 0xbf0   :  { %v3067_v38 = vpop.permute.xlu1 %3066  ;;  %v1685_v43 = vsel %vm475_vm0, %v1640_v23, 0  ;;  %v3079_v49 = vunpack.i.h.bf16 %v3077_v45  ;;  %v3078_v50 = vunpack.i.l.bf16 %v3077_v45 }
 0xbf1   :  { %2974 = vmatprep.subr.msk.bf16.mxu0 %vm475_vm0, %v1639_v36  ;;  %v1682_v37 = vsel %vm475_vm0, %v1639_v36, 0  ;;  %v3069_v39 = vunpack.i.h.bf16 %v3067_v38  ;;  %v3068_v40 = vunpack.i.l.bf16 %v3067_v38 }
 0xbf2   :  { %2920 = vmatpush3.bf16.xpose.msra.mxu0 %v1682_v37  ;;  %v1616_v52 = vpack.c.bf16 %v3079_v49, %v3078_v50 }
 0xbf3   :  { %2975 = vmatprep.subr.msk.bf16.mxu0 %vm475_vm0, %v1640_v23  ;;  %v1641_v42 = vpack.c.bf16 %v3069_v39, %v3068_v40 }
 0xbf4   :  { %v3072_v44 = vpop.permute.xlu1 %3071 }
 0xbf5   :  { %v1688_v46 = vsel %vm475_vm0, %v1641_v42, 0  ;;  %v3074_v47 = vunpack.i.h.bf16 %v3072_v44  ;;  %v3073_v48 = vunpack.i.l.bf16 %v3072_v44 }
 0xbf7   :  { %v1615_v51 = vpack.c.bf16 %v3074_v47, %v3073_v48 }
 0xbf8   :  { %v3082_v55 = vpop.permute.xlu1 %3081 }
 0xbf9   :  { %v3084_v56 = vunpack.i.h.bf16 %v3082_v55  ;;  %v3083_v57 = vunpack.i.l.bf16 %v3082_v55 }
 0xbfa   :  { %2922 = vmatpush3.bf16.xpose.msra.mxu0 %v1685_v43 }
 0xbfb   :  { %2976 = vmatprep.subr.msk.bf16.mxu0 %vm475_vm0, %v1641_v42  ;;  %v1617_v58 = vpack.c.bf16 %v3084_v56, %v3083_v57 }
 0xc02   :  { %2924 = vmatpush3.bf16.xpose.msra.mxu0 %v1688_v46 }
 0xc03   :  { %2949 = vmatprep.subr.bf16.mxu0 %v3558_v41 }
 0xc09   :  { %2926 = vmatmul.mubr.msk.bf16.vlgmr.msra.gmra.mrb[20].mxu0 %vm475_vm0, %v1615_v51 }
 0xc0a   :  { %2929 = vmatprep.mubr.msk.bf16.mxu0 %vm475_vm0, %v1616_v52 }
 0xc11   :  { %2930 = vmatmul.mubr.msk.bf16.gmra.mrb[24].mxu0 %vm475_vm0, %v1617_v58 }
 0xc12   :  { %2965 = vmatprep.mubr.msk.bf16.mxu0 %vm3559_vm1, %v3558_v41 }
 0xcdc   :  { %v2927_v59 = vpop.f32.mrb[20].mxu0 }
 0xcdd   :  { %v1724_v61 = vpop.f32.mrb[21].mxu0  ;;  %v1733_v5 = vadd.f32 %v3372_v4, %v2927_v59 }
 0xcde   :  { %v1725_v60 = vadd.f32 %v3371_v62, %v1724_v61  ;;  %v2928_v63 = vpop.f32.mrb[22].mxu0 }
 0xcdf   :  { %v1727_v3 = vpop.f32.mrb[23].mxu0  ;;  %v1736_v11 = vadd.f32 %v3374_v10, %v2928_v63  ;;  %v1761_v14 = vsel %vm565_vm2, %v1733_v5, -inf }
 0xce0   :  { %v1728_v7 = vadd.f32 %v3373_v6, %v1727_v3  ;;  %v1755_v8 = vsel %vm565_vm2, %v1725_v60, -inf }
 0xce1   :  { %1756 = vmax.xlane.f32.xlu0 %v1755_v8  ;;  %v1764_v21 = vsel %vm565_vm2, %v1736_v11, -inf }
 0xce2   :  { %v1758_v9 = vsel %vm565_vm2, %v1728_v7, -inf }
 0xce3   :  { %1759 = vmax.xlane.f32.xlu1 %v1758_v9 }
 0xce4   :  { %v2931_v12 = vpop.f32.mrb[24].mxu0 }
 0xce5   :  { %v1740_v15 = vpop.f32.mrb[25].mxu0  ;;  %1762 = vmax.xlane.f32.xlu0 %v1761_v14  ;;  %v1749_v26 = vadd.f32 %v3376_v53, %v2931_v12 }
 0xce6   :  { %v1741_v19 = vadd.f32 %v3375_v16, %v1740_v15  ;;  %v2932_v20 = vpop.f32.mrb[26].mxu0 }
 0xce7   :  { %v1743_v25 = vpop.f32.mrb[27].mxu0  ;;  %v1752_v18 = vadd.f32 %v3378_v13, %v2932_v20  ;;  %v1773_v29 = vsel %vm565_vm2, %v1749_v26, -inf }
 0xce8   :  { %v1744_v27 = vadd.f32 %v3377_v54, %v1743_v25  ;;  %v1767_v17 = vsel %vm565_vm2, %v1741_v19, -inf }
 0xce9   :  { %1768 = vmax.xlane.f32.xlu1 %v1767_v17  ;;  %1765 = vmax.xlane.f32.xlu0 %v1764_v21  ;;  %v1776_v31 = vsel %vm565_vm2, %v1752_v18, -inf }
 0xcea   :  { %v1770_v30 = vsel %vm565_vm2, %v1744_v27, -inf }
 0xced   :  { %1774 = vmax.xlane.f32.xlu1 %v1773_v29  ;;  %1771 = vmax.xlane.f32.xlu0 %v1770_v30 }
 0xcf1   :  { %1777 = vmax.xlane.f32.xlu0 %v1776_v31 }
 0xcfe   :  { %3086 = vrot.lane.b32.xlu1 %v3914_v28, %s3557_s19 }
 0xd6e   :  { %v1757_v32 = vpop.xlane.xlu0 %1756 }
 0xd6f   :  { %v1779_v33 = vsub.f32 %v1725_v60, %v1757_v32 }
 0xd70   :  { %v1760_v34 = vpop.xlane.xlu1 %1759 }
 0xd71   :  { %v1787_v23 = vmul.f32 1.442695, %v1779_v33  ;;  %v1780_v38 = vsub.f32 %v1728_v7, %v1760_v34 }
 0xd72   :  { %v1763_v35 = vpop.xlane.xlu0 %1762 }
 0xd73   :  { %v1781_v36 = vsub.f32 %v1733_v5, %v1763_v35  ;;  %v1789_v45 = vmul.f32 1.442695, %v1780_v38 }
 0xd75   :  { %v1791_v37 = vmul.f32 1.442695, %v1781_v36 }
 0xd76   :  { %v1769_v39 = vpop.xlane.xlu1 %1768  ;;  %v1766_v40 = vpop.xlane.xlu0 %1765 }
 0xd77   :  { %3323 = vpow2.f32 %v1791_v37  ;;  %v1782_v42 = vsub.f32 %v1736_v11, %v1766_v40  ;;  %v1783_v43 = vsub.f32 %v1741_v19, %v1769_v39 }
 0xd78   :  { %3325 = vpow2.f32 %v1787_v23 }
 0xd79   :  { %v1793_v44 = vmul.f32 1.442695, %v1782_v42  ;;  %v1795_v49 = vmul.f32 1.442695, %v1783_v43 }
 0xd7a   :  { %v1775_v46 = vpop.xlane.xlu1 %1774  ;;  %v1772_v47 = vpop.xlane.xlu0 %1771 }
 0xd7b   :  { %v1785_v48 = vsub.f32 %v1749_v26, %v1775_v46  ;;  %3327 = vpow2.f32 %v1793_v44  ;;  %v1784_v51 = vsub.f32 %v1744_v27, %v1772_v47 }
 0xd7c   :  { %3329 = vpow2.f32 %v1789_v45 }
 0xd7d   :  { %v1799_v50 = vmul.f32 1.442695, %v1785_v48  ;;  %v1797_v60 = vmul.f32 1.442695, %v1784_v51 }
 0xd7e   :  { %v3087_v52 = vpop.permute.xlu1 %3086  ;;  %v1778_v55 = vpop.xlane.xlu0 %1777 }
 0xd7f   :  { %3331 = vpow2.f32 %v1799_v50  ;;  %v3089_v56 = vunpack.i.h.bf16 %v3087_v52  ;;  %v3088_v57 = vunpack.i.l.bf16 %v3087_v52  ;;  %v1786_v58 = vsub.f32 %v1752_v18, %v1778_v55 }
 0xd80   :  { %3333 = vpow2.f32 %v1795_v49 }
 0xd81   :  { %v3946_v59 = vpop.eup %3323  ;;  %v1663_v61 = vpack.c.bf16 %v3089_v56, %v3088_v57  ;;  %v1801_v62 = vmul.f32 1.442695, %v1786_v58  ;;  %v3227_v56 = vld [vmem:[#allocation8 + $0x40] sm:$0xff]   ;;  %v3228_v57 = vld [vmem:[#allocation8 + $0x48] sm:$0xff]   ;;  %v3229_v58 = vld [vmem:[#allocation8 + $0x50] sm:$0xff]  }
 0xd82   :  { %v1809_v63 = vsel %vm565_vm2, %v3946_v59, 0.0  ;;  %v3326_v3 = vpop.eup %3325  ;;  %2950 = vmatpush3.bf16.msra.mxu0 %v3227_v56  ;;  %v3252_v56 = vld [vmem:[#allocation10 + $0xd4] ss:$8 sps:$4 sm:$0xff]  }
 0xd83   :  { %3335 = vpow2.f32 %v1801_v62  ;;  %2935 = vmatprep.subr.bf16.mxu1 %v1663_v61  ;;  %1810 = vadd.xlane.f32.xlu1 %v1809_v63  ;;  %v1803_v5 = vsel %vm565_vm2, %v3326_v3, 0.0  ;;  %v3233_v62 = vld [vmem:[#allocation8 + $0x70] sm:$0xff]  }
 0xd84   :  { %2936 = vmatpush3.bf16.msra.mxu1 %v1663_v61  ;;  %3337 = vpow2.f32 %v1797_v60  ;;  %2951 = vmatprep.subr.bf16.mxu0 %v3558_v41  ;;  %v3231_v61 = vld [vmem:[#allocation8 + $0x60] sm:$0xff]  }
 0xd85   :  { %v3328_v4 = vpop.eup %3327 }
 0xd86   :  { %v1812_v6 = vsel %vm565_vm2, %v3328_v4, 0.0  ;;  %v3330_v7 = vpop.eup %3329  ;;  %2952 = vmatpush3.bf16.msra.mxu0 %v3228_v57  ;;  %v3250_v57 = vld [vmem:[#allocation10 + $0xd0] ss:$8 sps:$4 sm:$0xff]  }
 0xd87   :  { %1804 = vadd.xlane.f32.xlu1 %v1803_v5  ;;  %1813 = vadd.xlane.f32.xlu0 %v1812_v6  ;;  %v1806_v11 = vsel %vm565_vm2, %v3330_v7, 0.0  ;;  %v3234_v6 = vld [vmem:[#allocation8 + $0x78] sm:$0xff]  }
 0xd88   :  { %2953 = vmatprep.subr.bf16.mxu0 %v3558_v41 }
 0xd89   :  { %v3952_v8 = vpop.eup %3331 }
 0xd8a   :  { %v1821_v9 = vsel %vm565_vm2, %v3952_v8, 0.0  ;;  %v3334_v10 = vpop.eup %3333  ;;  %2954 = vmatpush3.bf16.msra.mxu0 %v3229_v58  ;;  %v3255_v58 = vld [vmem:[#allocation10 + $0xe4] ss:$8 sps:$4 sm:$0xff]  }
 0xd8b   :  { %1822 = vadd.xlane.f32.xlu1 %v1821_v9  ;;  %1807 = vadd.xlane.f32.xlu0 %v1806_v11  ;;  %v1815_v14 = vsel %vm565_vm2, %v3334_v10, 0.0 }
 0xd8c   :  { %2955 = vmatprep.subr.bf16.mxu0 %v3558_v41 }
 0xd8d   :  { %v3336_v12 = vpop.eup %3335 }
 0xd8e   :  { %v1824_v15 = vsel %vm565_vm2, %v3336_v12, 0.0  ;;  %v3338_v16 = vpop.eup %3337 }
 0xd8f   :  { %1816 = vadd.xlane.f32.xlu1 %v1815_v14  ;;  %1825 = vadd.xlane.f32.xlu0 %v1824_v15  ;;  %v1818_v19 = vsel %vm565_vm2, %v3338_v16, 0.0 }
 0xd93   :  { %1819 = vadd.xlane.f32.xlu0 %v1818_v19 }
 0xda0   :  { %3096 = vrot.lane.b32.xlu1 %v3914_v28, %s3556_s29 }
 0xda9   :  { %3091 = vrot.lane.b32.xlu0 %v3914_v28, %s4055_s8 }
 0xe10   :  { %v1811_v20 = vpop.xlane.xlu1 %1810 }
 0xe14   :  { %v1805_v25 = vpop.xlane.xlu1 %1804  ;;  %v1814_v53 = vpop.xlane.xlu0 %1813 }
 0xe15   :  { %3339 = vrcp.f32 %v1805_v25 }
 0xe18   :  { %v1823_v26 = vpop.xlane.xlu1 %1822  ;;  %v1808_v54 = vpop.xlane.xlu0 %1807 }
 0xe19   :  { %3341 = vrcp.f32 %v1808_v54 }
 0xe1a   :  { %3343 = vrcp.f32 %v1814_v53 }
 0xe1b   :  { %3345 = vrcp.f32 %v1811_v20 }
 0xe1c   :  { %v1817_v27 = vpop.xlane.xlu1 %1816  ;;  %v1826_v17 = vpop.xlane.xlu0 %1825 }
 0xe1d   :  { %3347 = vrcp.f32 %v1817_v27 }
 0xe1f   :  { %v3340_v13 = vpop.eup %3339 }
 0xe20   :  { %v1820_v21 = vpop.xlane.xlu0 %1819  ;;  %v3097_v18 = vpop.permute.xlu1 %3096  ;;  %v1835_v31 = vmul.f32 %v3340_v13, %v3326_v3 }
 0xe21   :  { %3349 = vrcp.f32 %v1820_v21  ;;  %v3099_v32 = vunpack.i.h.bf16 %v3097_v18  ;;  %v3098_v33 = vunpack.i.l.bf16 %v3097_v18 }
 0xe22   :  { %3351 = vrcp.f32 %v1826_v17 }
 0xe23   :  { %v3342_v29 = vpop.eup %3341  ;;  %3353 = vrcp.f32 %v1823_v26  ;;  %v1665_v39 = vpack.c.bf16 %v3099_v32, %v3098_v33 }
 0xe24   :  { %v3092_v30 = vpop.permute.xlu0 %3091  ;;  %v1836_v28 = vmul.f32 %v3342_v29, %v3330_v7  ;;  %v3344_v37 = vpop.eup %3343 }
 0xe25   :  { %v3094_v34 = vunpack.i.h.bf16 %v3092_v30  ;;  %v3093_v35 = vunpack.i.l.bf16 %v3092_v30  ;;  %v3346_v38 = vpop.eup %3345  ;;  %v1838_v43 = vmul.f32 %v3344_v37, %v3328_v4  ;;  %v2661_v30 = vld [vmem:[%s4040_s5 + $0x1] ss:$0 sm:$0xff]  ;;  %v3235_v37 = vld [vmem:[#allocation10 + $0x80] ss:$8 sps:$4 sm:$0xff]  }
 0xe26   :  { %v1843_v36 = vpack.c.bf16 %v1836_v28, %v1835_v31  ;;  %v1837_v45 = vmul.f32 %v3346_v38, %v3946_v59  ;;  %v3230_v59 = vld [vmem:[#allocation8 + $0x58] sm:$0xff]   ;;  %v3237_v38 = vld [vmem:[#allocation10 + $0x84] ss:$8 sps:$4 sm:$0xff]  }
 0xe27   :  { %v1664_v23 = vpack.c.bf16 %v3094_v34, %v3093_v35  ;;  %v3348_v40 = vpop.eup %3347  ;;  %2956 = vmatpush3.bf16.msra.mxu0 %v3230_v59  ;;  %v3253_v59 = vld [vmem:[#allocation10 + $0xe0] ss:$8 sps:$4 sm:$0xff]  }
 0xe28   :  { %2941 = vmatprep.mubr.msk.bf16.mxu1 %vm565_vm2, %v1843_v36  ;;  %v1839_v46 = vmul.f32 %v3348_v40, %v3334_v10  ;;  %v1844_v47 = vpack.c.bf16 %v1838_v43, %v1837_v45  ;;  %2957 = vmatprep.subr.bf16.mxu0 %v3558_v41  ;;  %v3238_v40 = vld [vmem:[#allocation10 + $0x90] ss:$8 sps:$4 sm:$0xff]  }
 0xe29   :  { %2937 = vmatprep.subr.bf16.mxu1 %v1664_v23 }
 0xe2a   :  { %2938 = vmatpush3.bf16.msra.mxu1 %v1664_v23 }
 0xe2b   :  { %v3350_v42 = vpop.eup %3349  ;;  %2939 = vmatprep.subr.bf16.mxu1 %v1665_v39  ;;  %2958 = vmatpush3.bf16.msra.mxu0 %v3231_v61  ;;  %v3256_v61 = vld [vmem:[#allocation10 + $0xf0] ss:$8 sps:$4 sm:$0xff]  }
 0xe2c   :  { %v1840_v44 = vmul.f32 %v3350_v42, %v3338_v16  ;;  %v3352_v48 = vpop.eup %3351  ;;  %2959 = vmatprep.subr.bf16.mxu0 %v3558_v41 }
 0xe2d   :  { %v3354_v50 = vpop.eup %3353  ;;  %v1842_v51 = vmul.f32 %v3352_v48, %v3336_v12 }
 0xe2e   :  { %2940 = vmatpush3.bf16.msra.mxu1 %v1665_v39  ;;  %v1845_v49 = vpack.c.bf16 %v1840_v44, %v1839_v46  ;;  %v1841_v52 = vmul.f32 %v3354_v50, %v3952_v8  ;;  %v3240_v39 = vld [vmem:[#allocation10 + $0x94] ss:$8 sps:$4 sm:$0xff]  }
 0xe2f   :  { %2224 = vmatprep.subr.bf16.mxu1 %v3237_v38  ;;  %v3246_v50 = vld [vmem:[#allocation10 + $0xb4] ss:$8 sps:$4 sm:$0xff]  }
 0xe30   :  { %v1846_v55 = vpack.c.bf16 %v1842_v51, %v1841_v52  ;;  %v3244_v51 = vld [vmem:[#allocation10 + $0xb0] ss:$8 sps:$4 sm:$0xff]   ;;  %v3249_v52 = vld [vmem:[#allocation10 + $0xc4] ss:$8 sps:$4 sm:$0xff]  }
 0xe31   :  { %2942 = vmatmul.mubr.msk.bf16.vlgmr.msra.gmra.mrb[24].mxu1 %vm565_vm2, %v1844_v47 }
 0xe32   :  { %2945 = vmatprep.mubr.msk.bf16.mxu1 %vm565_vm2, %v1845_v49  ;;  %2225 = vmatpush1.bf16.msra.mxu1 %v3235_v37  ;;  %v3241_v49 = vld [vmem:[#allocation10 + $0xa0] ss:$8 sps:$4 sm:$0xff]  }
 0xe33   :  { %2226 = vmatprep.subr.bf16.mxu1 %v3240_v39 }
 0xe36   :  { %2227 = vmatpush1.bf16.msra.mxu1 %v3238_v40 }
 0xe39   :  { %2946 = vmatmul.mubr.msk.bf16.gmra.mrb[28].mxu1 %vm565_vm2, %v1846_v55  ;;  %v3247_v55 = vld [vmem:[#allocation10 + $0xc0] ss:$8 sps:$4 sm:$0xff]  }
 0xe3a   :  { %2256 = vmatprep.mubr.bf16.mxu1 %v3555_v0  ;;  %v3232_v0 = vld [vmem:[#allocation8 + $0x68] sm:$0xff]  }
 0xe3b   :  { %2960 = vmatpush3.bf16.msra.mxu0 %v3232_v0  ;;  %v3258_v0 = vld [vmem:[#allocation10 + $0xf4] ss:$8 sps:$4 sm:$0xff]  }
 0xe3c   :  { %2961 = vmatprep.subr.bf16.mxu0 %v3558_v41 }
 0xe3f   :  { %2962 = vmatpush3.bf16.msra.mxu0 %v3233_v62 }
 0xe40   :  { %2963 = vmatprep.subr.bf16.mxu0 %v3558_v41 }
 0xe43   :  { %2964 = vmatpush3.bf16.msra.mxu0 %v3234_v6 }
 0xf04   :  { %v2943_v60 = vpop.f32.mrb[24].mxu1 }
 0xf05   :  { %v1893_v63 = vpop.f32.mrb[25].mxu1 }
 0xf06   :  { %v2944_v3 = vpop.f32.mrb[26].mxu1 }
 0xf07   :  { %v3100_v4 = vpack.i.bf16 %v2944_v3, %v2943_v60  ;;  %v1896_v5 = vpop.f32.mrb[27].mxu1 }
 0xf09   :  { %3101 = vrot.lane.b32.xlu1 %v3100_v4, %s3556_s29 }
 0xf0c   :  { %v2947_v7 = vpop.f32.mrb[28].mxu1 }
 0xf0d   :  { %v1909_v8 = vpop.f32.mrb[29].mxu1 }
 0xf0e   :  { %v2948_v9 = vpop.f32.mrb[30].mxu1 }
 0xf0f   :  { %v3110_v10 = vpack.i.bf16 %v2948_v9, %v2947_v7  ;;  %v1912_v11 = vpop.f32.mrb[31].mxu1 }
 0xf10   :  { %v3105_v12 = vpack.i.bf16 %v1912_v11, %v1909_v8  ;;  %v2672_v8 = vld [vmem:[%s4041_s6 + $0x1] ss:$0 sm:$0xff] }
 0xf11   :  { %3111 = vrot.lane.b32.xlu1 %v3110_v10, %s3557_s19 }
 0xf12   :  { %3106 = vrot.lane.b32.xlu0 %v3105_v12, %s4055_s8  ;;  %v2673_v12 = vld [vmem:[%s4042_s7 + $0x1] ss:$0 sm:$0xff] }
 0xf7b   :  { %v3102_v14 = vpop.permute.xlu1 %3101 }
 0xf7c   :  { %v3104_v15 = vunpack.i.h.bf16 %v3102_v14  ;;  %v3103_v16 = vunpack.i.l.bf16 %v3102_v14 }
 0xf7e   :  { %v1948_v53 = vsel %vm475_vm0, %v1893_v63, %v3103_v16  ;;  %v1949_v26 = vsel %vm475_vm0, %v1896_v5, %v3104_v15 }
 0xf83   :  { %v3112_v41 = vpop.permute.xlu1 %3111 }
 0xf84   :  { %v3107_v19 = vpop.permute.xlu0 %3106  ;;  %v3114_v54 = vunpack.i.h.bf16 %v3112_v41  ;;  %v3113_v27 = vunpack.i.l.bf16 %v3112_v41 }
 0xf85   :  { %v3109_v20 = vunpack.i.h.bf16 %v3107_v19  ;;  %v3108_v25 = vunpack.i.l.bf16 %v3107_v19  ;;  %v3259_v19 = vld [vmem:[#allocation11 + $0xc0] sm:$0xff]  }
 0xf86   :  { %2803 = vmatprep.subr.bf16.mxu0 %v3259_v19 }
 0xf87   :  { %v1951_v17 = vsel %vm565_vm2, %v1949_v26, %v3109_v20  ;;  %v1950_v21 = vsel %vm565_vm2, %v1948_v53, %v3108_v25  ;;  %v3260_v20 = vld [vmem:[#allocation11 + $0x80] sm:$0xff]   ;;  %v3261_v25 = vld [vmem:[#allocation11 + $0xc8] sm:$0xff]   ;;  %v3263_v26 = vld [vmem:[#allocation11 + $0xd0] sm:$0xff]  }
 0xf88   :  { %v1953_v13 = vsel %vm763_vm3, %v1951_v17, %v3114_v54  ;;  %v1952_v18 = vsel %vm763_vm3, %v1950_v21, %v3113_v27  ;;  %v3262_v53 = vld [vmem:[#allocation11 + $0x88] sm:$0xff]   ;;  %v3264_v54 = vld [vmem:[#allocation11 + $0x90] sm:$0xff]   ;;  %v3265_v27 = vld [vmem:[#allocation11 + $0xd8] sm:$0xff]  }
 0xf89   :  { %v1954_v29 = vpack.c.bf16 %v1953_v13, %v1952_v18  ;;  %v3266_v17 = vld [vmem:[#allocation11 + $0x98] sm:$0xff]   ;;  %v3267_v21 = vld [vmem:[#allocation11 + $0xe0] sm:$0xff]   ;;  %v3269_v18 = vld [vmem:[#allocation11 + $0xe8] sm:$0xff]  }
 0xf8a   :  { %v3268_v13 = vld [vmem:[#allocation11 + $0xa0] sm:$0xff]  }
 0xf8b   :  { %2966 = vmatmul.mubr.bf16.vlgmr.msra.gmra.mrb[28].mxu0 %v1954_v29  ;;  %v3270_v29 = vld [vmem:[#allocation11 + $0xa8] sm:$0xff]  }
 0xf8c   :  { %2804 = vmatpush3.bf16.msra.mxu0 %v3260_v20 }
 0xf8d   :  { %2805 = vmatprep.subr.bf16.mxu0 %v3261_v25 }
 0xf90   :  { %2806 = vmatpush3.bf16.msra.mxu0 %v3262_v53 }
 0xf91   :  { %2807 = vmatprep.subr.bf16.mxu0 %v3263_v26  ;;  %v2692_v26 = vld [vmem:[%s4046_s11 + $0x1] ss:$0 sm:$0xff] }
 0xf94   :  { %2808 = vmatpush3.bf16.msra.mxu0 %v3264_v54 }
 0xf95   :  { %2809 = vmatprep.subr.bf16.mxu0 %v3265_v27 }
 0xf98   :  { %2810 = vmatpush3.bf16.msra.mxu0 %v3266_v17 }
 0xf99   :  { %2811 = vmatprep.subr.bf16.mxu0 %v3267_v21 }
 0xf9c   :  { %2812 = vmatpush3.bf16.msra.mxu0 %v3268_v13 }
 0xf9d   :  { %2813 = vmatprep.subr.bf16.mxu0 %v3269_v18 }
 0xfa0   :  { %2814 = vmatpush3.bf16.msra.mxu0 %v3270_v29 }
0x105e   :  { %v2062_v31 = vpop.f32.mrb[28].mxu0 }
0x105f   :  { %v2063_v28 = vadd.f32 %v2661_v30, %v2062_v31  ;;  %v2967_v32 = vpop.f32.mrb[29].mxu0  ;;  %v3272_v31 = vld [vmem:[#allocation11 + $0xb0] sm:$0xff]  }
0x1060   :  { %v2065_v33 = vpop.f32.mrb[30].mxu0  ;;  %v3274_v32 = vld [vmem:[#allocation11 + $0xb8] sm:$0xff]  }
0x1061   :  { %v2066_v34 = vadd.f32 %v2661_v30, %v2065_v33  ;;  %v2968_v35 = vpop.f32.mrb[31].mxu0  ;;  %v2069_v36 = vadd.f32 %v2063_v28, %v3900_v1  ;;  %v3271_v30 = vld [vmem:[#allocation11 + $0xf0] sm:$0xff]   ;;  %v3273_v28 = vld [vmem:[#allocation11 + $0xf8] sm:$0xff]  }
0x1062   :  { %2815 = vmatprep.subr.bf16.mxu0 %v3271_v30  ;;  %v2674_v33 = vld [vmem:[%s4044_s9 + $0x2] sm:$0x3] }
0x1063   :  { %2075 = vadd.xlane.f32.xlu0 %v2069_v36  ;;  %v2070_v23 = vadd.f32 %v2066_v34, %v3902_v2  ;;  %v3243_v2 = vld [vmem:[#allocation10 + $0xa4] ss:$8 sps:$4 sm:$0xff]   ;;  %2816 = vmatpush3.bf16.msra.mxu0 %v3272_v31  ;;  %v2137_v34 = vrot.slane %v2674_v33, %v3754_v22  ;;  %v2141_v35 = vrot.slane %v2674_v33, %v3762_v24 }
0x1064   :  { %2228 = vmatprep.subr.bf16.mxu1 %v3243_v2  ;;  %2817 = vmatprep.subr.bf16.mxu0 %v3273_v28 }
0x1065   :  { %2077 = vadd.xlane.f32.xlu1 %v2070_v23  ;;  %2229 = vmatpush1.bf16.msra.mxu1 %v3241_v49 }
0x1066   :  { %2230 = vmatprep.subr.bf16.mxu1 %v3246_v50 }
0x1067   :  { %2818 = vmatpush3.bf16.msra.mxu0 %v3274_v32 }
0x1069   :  { %2231 = vmatpush1.bf16.msra.mxu1 %v3244_v51 }
0x106a   :  { %2232 = vmatprep.subr.bf16.mxu1 %v3249_v52 }
0x106d   :  { %2233 = vmatpush1.bf16.msra.mxu1 %v3247_v55 }
0x106e   :  { %2234 = vmatprep.subr.bf16.mxu1 %v3252_v56 }
0x1071   :  { %2235 = vmatpush1.bf16.msra.mxu1 %v3250_v57 }
0x1072   :  { %2236 = vmatprep.subr.bf16.mxu1 %v3255_v58 }
0x1075   :  { %2237 = vmatpush1.bf16.msra.mxu1 %v3253_v59 }
0x1076   :  { %2238 = vmatprep.subr.bf16.mxu1 %v3258_v0 }
0x1079   :  { %2239 = vmatpush1.bf16.msra.mxu1 %v3256_v61 }
0x10f0   :  { %v2076_v42 = vpop.xlane.xlu0 %2075 }
0x10f1   :  { %v2079_v43 = vmul.f32 0.0078125, %v2076_v42 }
0x10f2   :  { %v2078_v44 = vpop.xlane.xlu1 %2077 }
0x10f3   :  { %v2081_v45 = vsub.f32 %v2069_v36, %v2079_v43  ;;  %v2080_v46 = vmul.f32 0.0078125, %v2078_v44 }
0x10f5   :  { %v2082_v47 = vsub.f32 %v2070_v23, %v2080_v46  ;;  %v2083_v48 = vmul.f32 %v2081_v45, %v2081_v45 }
0x10f7   :  { %2085 = vadd.xlane.f32.xlu0 %v2083_v48  ;;  %v2084_v1 = vmul.f32 %v2082_v47, %v2082_v47 }
0x10fb   :  { %2087 = vadd.xlane.f32.xlu0 %v2084_v1 }
0x1184   :  { %v2086_v62 = vpop.xlane.xlu0 %2085 }
0x1185   :  { %v2089_v60 = vmul.f32 0.0078125, %v2086_v62 }
0x1187   :  { %v2091_v63 = vadd.f32 1e-12, %v2089_v60 }
0x1188   :  { %v2088_v3 = vpop.xlane.xlu0 %2087 }
0x1189   :  { %3355 = vrsqrt.f32 %v2091_v63  ;;  %v2090_v4 = vmul.f32 0.0078125, %v2088_v3 }
0x118b   :  { %v2092_v5 = vadd.f32 1e-12, %v2090_v4 }
0x118d   :  { %3357 = vrsqrt.f32 %v2092_v5 }
0x1193   :  { %v3356_v6 = vpop.eup %3355 }
0x1194   :  { %v2095_v7 = vmul.f32 %v3356_v6, %v2081_v45 }
0x1196   :  { %v2103_v10 = vmul.f32 %v2672_v8, %v2095_v7 }
0x1197   :  { %v3358_v9 = vpop.eup %3357 }
0x1198   :  { %v2096_v11 = vmul.f32 %v3358_v9, %v2082_v47  ;;  %v3998_v15 = vadd.f32 %v2673_v12, %v2103_v10 }
0x119a   :  { %v2104_v14 = vmul.f32 %v2672_v8, %v2096_v11 }
0x119c   :  { %v4000_v16 = vadd.f32 %v2673_v12, %v2104_v14 }
0x119e   :  { %v2113_v41 = vpack.c.bf16 %v4000_v16, %v3998_v15 }
0x11a0   :  { %2257 = vmatmul.mubr.bf16.vlgmr.msra.gmra.mrb[32].mxu1 %v2113_v41 }
0x1273   :  { %v2258_v36 = vpop.f32.mrb[32].mxu1 }
0x1274   :  { %v2259_v23 = vadd.f32 %v2258_v36, %v2137_v34  ;;  %v2260_v37 = vpop.f32.mrb[33].mxu1 }
0x1275   :  { %v2261_v38 = vadd.f32 %v2260_v37, %v2141_v35  ;;  %v2262_v39 = vpop.f32.mrb[34].mxu1 }
0x1276   :  { %v2267_v40 = vmul.f32 %v2259_v23, %v2259_v23  ;;  %v2263_v42 = vadd.f32 %v2262_v39, %v2137_v34  ;;  %v2264_v43 = vpop.f32.mrb[35].mxu1 }
0x1277   :  { %v2268_v44 = vmul.f32 %v2261_v38, %v2261_v38  ;;  %v2265_v45 = vadd.f32 %v2264_v43, %v2141_v35 }
0x1278   :  { %v2271_v46 = vmul.f32 %v2267_v40, %v2259_v23  ;;  %v2269_v47 = vmul.f32 %v2263_v42, %v2263_v42 }
0x1279   :  { %v2272_v48 = vmul.f32 %v2268_v44, %v2261_v38  ;;  %v2270_v1 = vmul.f32 %v2265_v45, %v2265_v45  ;;  %v2711_v44 = vld [vmem:[%s4047_s12 + $0x1] ss:$0 sm:$0xff] }
0x127a   :  { %v2275_v2 = vmul.f32 0.044715, %v2271_v46  ;;  %v2273_v49 = vmul.f32 %v2269_v47, %v2263_v42  ;;  %v2712_v47 = vld [vmem:[%s4048_s13 + $0x1] ss:$0 sm:$0xff] }
0x127b   :  { %v2276_v50 = vmul.f32 0.044715, %v2272_v48  ;;  %v2274_v22 = vmul.f32 %v2270_v1, %v2265_v45 }
0x127c   :  { %v2279_v51 = vadd.f32 %v2275_v2, %v2259_v23  ;;  %v2277_v24 = vmul.f32 0.044715, %v2273_v49 }
0x127d   :  { %v2280_v52 = vadd.f32 %v2276_v50, %v2261_v38  ;;  %v2278_v55 = vmul.f32 0.044715, %v2274_v22 }
0x127e   :  { %v2283_v56 = vmul.f32 0.7978846, %v2279_v51  ;;  %v2281_v57 = vadd.f32 %v2277_v24, %v2263_v42 }
0x127f   :  { %v2284_v58 = vmul.f32 0.7978846, %v2280_v52  ;;  %v2282_v59 = vadd.f32 %v2278_v55, %v2265_v45 }
0x1280   :  { %3359 = vtanh.f32 %v2283_v56  ;;  %v2285_v61 = vmul.f32 0.7978846, %v2281_v57 }
0x1281   :  { %3361 = vtanh.f32 %v2284_v58  ;;  %v2286_v0 = vmul.f32 0.7978846, %v2282_v59 }
0x1282   :  { %3363 = vtanh.f32 %v2285_v61 }
0x1283   :  { %3365 = vtanh.f32 %v2286_v0 }
0x128a   :  { %v3360_v62 = vpop.eup %3359 }
0x128b   :  { %v3362_v60 = vpop.eup %3361  ;;  %v2291_v63 = vadd.f32 1.0, %v3360_v62 }
0x128c   :  { %v3364_v3 = vpop.eup %3363  ;;  %v2292_v4 = vadd.f32 1.0, %v3362_v60 }
0x128d   :  { %v3366_v5 = vpop.eup %3365  ;;  %v2295_v6 = vmul.f32 0.5, %v2291_v63  ;;  %v2293_v7 = vadd.f32 1.0, %v3364_v3 }
0x128e   :  { %v2294_v8 = vadd.f32 1.0, %v3366_v5  ;;  %v2296_v9 = vmul.f32 0.5, %v2292_v4 }
0x128f   :  { %v2297_v10 = vmul.f32 0.5, %v2293_v7  ;;  %v2299_v12 = vmul.f32 %v2295_v6, %v2259_v23 }
0x1290   :  { %v2298_v11 = vmul.f32 0.5, %v2294_v8  ;;  %v2300_v41 = vmul.f32 %v2296_v9, %v2261_v38 }
0x1291   :  { %v2301_v14 = vmul.f32 %v2297_v10, %v2263_v42 }
0x1292   :  { %v2302_v19 = vmul.f32 %v2298_v11, %v2265_v45 }
0x1293   :  { %v2303_v20 = vpack.c.bf16 %v2301_v14, %v2299_v12 }
0x1294   :  { %v2304_v25 = vpack.c.bf16 %v2302_v19, %v2300_v41 }
0x1296   :  { %2474 = vmatprep.mubr.bf16.mxu0 %v2304_v25 }
0x1297   :  { %2475 = vmatmul.mubr.bf16.vlgmr.msra.gmra.mrb[32].mxu0 %v2303_v20 }
0x136a   :  { %v2819_v53 = vpop.f32.mrb[32].mxu0 }
0x136b   :  { %v2820_v54 = vpop.f32.mrb[33].mxu0 }
0x136c   :  { %v2821_v27 = vadd.f32 %v2820_v54, %v2819_v53  ;;  %v2822_v17 = vpop.f32.mrb[34].mxu0 }
0x136d   :  { %v2823_v21 = vpop.f32.mrb[35].mxu0 }
0x136e   :  { %v2477_v13 = vadd.f32 %v2821_v27, %v2692_v26  ;;  %v2824_v18 = vadd.f32 %v2823_v21, %v2822_v17 }
0x1370   :  { %v2480_v29 = vadd.f32 %v2824_v18, %v2692_v26  ;;  %v2483_v30 = vadd.f32 %v2477_v13, %v3998_v15 }
0x1372   :  { %2489 = vadd.xlane.f32.xlu1 %v2483_v30  ;;  %v2484_v31 = vadd.f32 %v2480_v29, %v4000_v16 }
0x1374   :  { %2491 = vadd.xlane.f32.xlu0 %v2484_v31 }
0x13ff   :  { %v2490_v28 = vpop.xlane.xlu1 %2489 }
0x1400   :  { %v2493_v32 = vmul.f32 0.0078125, %v2490_v28 }
0x1401   :  { %v2492_v33 = vpop.xlane.xlu0 %2491 }
0x1402   :  { %v2495_v34 = vsub.f32 %v2483_v30, %v2493_v32  ;;  %v2494_v35 = vmul.f32 0.0078125, %v2492_v33 }
0x1404   :  { %v2496_v36 = vsub.f32 %v2484_v31, %v2494_v35  ;;  %v2497_v23 = vmul.f32 %v2495_v34, %v2495_v34 }
0x1406   :  { %2499 = vadd.xlane.f32.xlu1 %v2497_v23  ;;  %v2498_v37 = vmul.f32 %v2496_v36, %v2496_v36 }
0x1408   :  { %2501 = vadd.xlane.f32.xlu0 %v2498_v37 }
0x1493   :  { %v2500_v38 = vpop.xlane.xlu1 %2499 }
0x1494   :  { %v2503_v39 = vmul.f32 0.0078125, %v2500_v38 }
0x1495   :  { %v2502_v40 = vpop.xlane.xlu0 %2501 }
0x1496   :  { %v2505_v42 = vadd.f32 1e-12, %v2503_v39  ;;  %v2504_v43 = vmul.f32 0.0078125, %v2502_v40 }
0x1498   :  { %3367 = vrsqrt.f32 %v2505_v42  ;;  %v2506_v15 = vadd.f32 1e-12, %v2504_v43 }
0x149a   :  { %3369 = vrsqrt.f32 %v2506_v15 }
0x14a2   :  { %v3368_v16 = vpop.eup %3367 }
0x14a3   :  { %v2509_v45 = vmul.f32 %v3368_v16, %v2495_v34 }
0x14a4   :  { %v3370_v46 = vpop.eup %3369 }
0x14a5   :  { %v2510_v48 = vmul.f32 %v3370_v46, %v2496_v36  ;;  %v2517_v1 = vmul.f32 %v2711_v44, %v2509_v45 }
0x14a7   :  { %v2518_v2 = vmul.f32 %v2711_v44, %v2510_v48  ;;  %v2525_v49 = vadd.f32 %v2712_v47, %v2517_v1 }
0x14a9   :  { %v2526_v50 = vadd.f32 %v2712_v47, %v2518_v2  ;;  %2527 = vst [vmem:[#allocation13] sm:$0xff] %v2525_v49 }
0x14ab   :  { %2528 = vst [vmem:[#allocation13 + $0x8] sm:$0xff] %v2526_v50 }
0x14ac   :  { %3522 = shalt.err (!%p3519_p10)
}
0x14ad   :  { %s3523_s13 = scalar_lea.hbm %s4049_s14, 256 }
0x14ae   :  { %p3524_p11 = scmp.ne.s32.totalorder %s4049_s14, %s3523_s13  ;;  %p3527_p12 = scmp.lt.u32.totalorder %s3523_s13, %s4049_s14 }
0x14b0   :  { %p3529_p13 = pnand %p3527_p12, %p3524_p11 }
0x14b2   :  { %3532 = shalt.err (!%p3529_p13)
}
0x14b3   :  { %2540 = dma.vmem_to_hbm [thread:$0]  %s2535_s28, 256, %s4049_s14, [#allocation4], %s4054_s16, %s4054_s16, %s3546_s26  }
0x14b4   :  { %3541 = dma.done.wait [#allocation4], 256  }
0x14b5   :  { %3542 = vsyncadd [#allocation4], 4294967040 }
0x14b6   :  { %2544 = vsyncpa [#allocation3], 1 }
0x14b7   :  { %2545 = vsyncpa [#allocation6], 1 }
0x14b8   :  { %2546 = vsyncpa [#allocation9], 1 }
0x14b9   :  { %2547 = vsyncpa [#allocation12], 1 }
0x14ba   :  { %2548 = vsyncpa [#allocation4], 1 }

</bundles_post_ra>
